<compile_context>
chip_gen: v6e
topology: v6e:2x2x1
jax: 0.10.0
libtpu: 0.0.40
codegen_flags: <defaults>
</compile_context>

<pallas_src>
import math

import jax
import jax.numpy as jnp
import numpy as np
from jax import lax
from jax.experimental import pallas as pl
from jax.experimental.pallas import tpu as pltpu

NUM_HEADS = 4
BN_EPS = 1e-5
NEG_INF = -1e30   # additive mask value; stays in f32 (do not cast scores to fp16)


# ----------------------------------------------------------------------------- kernel
def _gnn_kernel(descs_ref, hmask_ref, gbias_ref,
                wqkv_ref, bqkv_ref, wm_ref, bm_ref,
                w1x_ref, w1m_ref, s1_ref, w2_ref, b2_ref,
                out_ref, d_ref):
    f32 = jnp.float32
    l = pl.program_id(0)
    S, B, N, D = d_ref.shape
    H = hmask_ref.shape[0]
    G = S * B * N                     # rows of the flattened slab (both sets, all batches)

    @pl.when(l == 0)
    def _():                          # load initial descriptors into the resident scratch
        d_ref[...] = descs_ref[...].astype(f32)

    x = d_ref[...].reshape(G, D)      # (G, D) current descriptors (previous layer output)

    # Fused q|k|v 1x1-conv projection: head-blocked out channels, 1/sqrt(dm) folded in q.
    qkv = jnp.dot(x, wqkv_ref[0], preferred_element_type=f32) + bqkv_ref[0]   # (G, 3D)
    q, k, v = qkv[:, :D], qkv[:, D:2 * D], qkv[:, 2 * D:]

    # Query-side head blocking: row h*G + i holds q_i restricted to head h's channels.
    hmask = hmask_ref[...]                                                    # (H, D)
    q_bd = (q[None, :, :] * hmask[:, None, :]).reshape(H * G, D)              # (H*G, D)

    # scores[h*G + i, m] = <q_h(i), k_h(m)> (scale already folded into wq).
    s = lax.dot_general(q_bd, k, (((1,), (1,)), ((), ())),
                        preferred_element_type=f32)                           # (H*G, G)
    # Per-layer additive mask encodes self vs cross routing and the batch block structure.
    s = s.reshape(H, G, G) + gbias_ref[0][None, :, :]

    # Exact per-(head, query) softmax: plain row reductions, exact divide.
    m = jnp.max(s, axis=-1, keepdims=True)
    e = jnp.exp(s - m)
    p = e / jnp.sum(e, axis=-1, keepdims=True)

    # PV in one matmul; fold head-blocked rows back to (G, D) head-blocked channels.
    msg_full = jnp.dot(p.reshape(H * G, G), v, preferred_element_type=f32)    # (H*G, D)
    msg = jnp.sum(msg_full.reshape(H, G, D) * hmask[:, None, :], axis=0)      # (G, D)
    msg = jnp.dot(msg, wm_ref[0], preferred_element_type=f32) + bm_ref[0]     # merge conv

    # MLP([2D, 2D, D]) on concat([x, msg]) with BN(eval) folded into w1/s1; w1 is split
    # into x / msg halves so the lane concatenate is never materialized.
    h1 = jnp.maximum(
        jnp.dot(x, w1x_ref[0], preferred_element_type=f32)
        + jnp.dot(msg, w1m_ref[0], preferred_element_type=f32)
        + s1_ref[0], 0.0)
    delta = jnp.dot(h1, w2_ref[0], preferred_element_type=f32) + b2_ref[0]

    new = (x + delta).reshape(S, B, N, D)                                     # residual
    d_ref[...] = new                  # stays resident for the next layer

    @pl.when(l == pl.num_programs(0) - 1)
    def _():
        out_ref[...] = new.astype(out_ref.dtype)


# ----------------------------------------------------------------------------- wrapper
_PARAM_ORDER = ('wqkv', 'bqkv', 'wm', 'bm', 'w1x', 'w1m', 's1', 'w2', 'b2')


def _layer_spec(arr):
    """BlockSpec selecting layer l's slice of a (L, ...) stacked parameter."""
    tail = tuple(arr.shape[1:])
    zeros = (0,) * len(tail)
    return pl.BlockSpec((1,) + tail, lambda l, _z=zeros: (l,) + _z)


def attentional_gnn(desc0, desc1, params, hmask, gbias):
    """desc0/desc1: (B, N, D) channels-last. params: dict of (L, ...) stacked weights.
    hmask: (H, D) head-channel indicator. gbias: (L, 2BN, 2BN) per-layer additive
    attention mask encoding self vs cross routing and batch blocks."""
    descs = jnp.stack([desc0, desc1], axis=0)            # (2, B, N, D)
    weights = [params[name] for name in _PARAM_ORDER]
    L = gbias.shape[0]

    in_specs = ([pl.BlockSpec(descs.shape, lambda l: (0, 0, 0, 0)),
                 pl.BlockSpec(hmask.shape, lambda l: (0, 0)),
                 _layer_spec(gbias)]
                + [_layer_spec(w) for w in weights])

    out = pl.pallas_call(
        _gnn_kernel,
        out_shape=jax.ShapeDtypeStruct(descs.shape, descs.dtype),
        grid_spec=pltpu.PrefetchScalarGridSpec(
            num_scalar_prefetch=0,
            grid=(L,),
            in_specs=in_specs,
            out_specs=pl.BlockSpec(descs.shape, lambda l: (0, 0, 0, 0)),
            scratch_shapes=[pltpu.VMEM(descs.shape, jnp.float32)],
        ),
        # Layers depend on each other through the resident scratch -> "arbitrary".
        compiler_params=pltpu.CompilerParams(dimension_semantics=("arbitrary",)),
    )(descs, hmask, gbias, *weights)
    return out[0], out[1]


# ------------------------------------------------------------------- constants (host side)
def build_masks(B, N, D, H, layer_names):
    dm = D // H
    G = 2 * B * N
    ch = np.arange(D)
    hmask = (ch[None, :] // dm == np.arange(H)[:, None]).astype(np.float32)    # (H, D)
    grp_q = np.arange(G)[:, None] // N          # group index = set*B + batch
    grp_k = np.arange(G)[None, :] // N
    self_bias = np.where(grp_q == grp_k, 0.0, NEG_INF).astype(np.float32)
    cross_bias = np.where((grp_q + B) % (2 * B) == grp_k, 0.0, NEG_INF).astype(np.float32)
    gbias = np.stack([cross_bias if n == 'cross' else self_bias for n in layer_names])
    return jnp.asarray(hmask), jnp.asarray(gbias)


# ------------------------------------------------------------------- parameter setup (glue)
def init_layer_params(key, D, H):
    """Deterministic synthetic parameters, PyTorch shapes: Conv1d weight (out, in)."""
    keys = jax.random.split(key, 16)

    def conv(kw, kb, c_out, c_in):
        bound = 1.0 / math.sqrt(c_in)
        W = jax.random.uniform(kw, (c_out, c_in), jnp.float32, -bound, bound)
        b = jax.random.uniform(kb, (c_out,), jnp.float32, -bound, bound)
        return W, b

    raw = {}
    raw['wq'], raw['bq'] = conv(keys[0], keys[1], D, D)
    raw['wk'], raw['bk'] = conv(keys[2], keys[3], D, D)
    raw['wv'], raw['bv'] = conv(keys[4], keys[5], D, D)
    raw['wm'], raw['bm'] = conv(keys[6], keys[7], D, D)
    raw['w1'], raw['b1'] = conv(keys[8], keys[9], 2 * D, 2 * D)
    raw['w2'], _ = conv(keys[10], keys[11], D, 2 * D)
    raw['b2'] = jnp.zeros((D,), jnp.float32)   # nn.init.constant_(self.mlp[-1].bias, 0.0)
    # BatchNorm1d(2D) -- eval-mode semantics with synthetic running statistics.
    raw['bn_gamma'] = 1.0 + 0.1 * jax.random.normal(keys[12], (2 * D,), jnp.float32)
    raw['bn_beta'] = 0.1 * jax.random.normal(keys[13], (2 * D,), jnp.float32)
    raw['bn_mean'] = 0.1 * jax.random.normal(keys[14], (2 * D,), jnp.float32)
    raw['bn_var'] = 1.0 + 0.1 * jnp.abs(jax.random.normal(keys[15], (2 * D,), jnp.float32))
    return raw


def to_kernel_params(raw, D, H):
    """Rearrange PyTorch-layout weights for the channels-last, head-blocked kernel:
    transpose 1x1-conv weights, permute q/k/v output channels to head-blocked order,
    fuse q|k|v, fold 1/sqrt(dm) into wq, fold eval-mode BatchNorm into w1, split w1."""
    dm = D // H
    # PyTorch's .view(B, dim, heads, N) splits channel c as c = d*H + h.
    # Kernel uses head-blocked channels c' = h*dm + d; perm[c'] = original channel.
    perm = np.array([d * H + h for h in range(H) for d in range(dm)])
    scale = 1.0 / math.sqrt(dm)
    wq = raw['wq'].T[:, perm] * scale
    bq = raw['bq'][perm] * scale
    wk, bk = raw['wk'].T[:, perm], raw['bk'][perm]
    wv, bv = raw['wv'].T[:, perm], raw['bv'][perm]
    kp = {}
    kp['wqkv'] = jnp.concatenate([wq, wk, wv], axis=1)               # (D, 3D)
    kp['bqkv'] = jnp.concatenate([bq, bk, bv])[None, :]              # (1, 3D)
    kp['wm'] = raw['wm'][:, perm].T          # consumes head-blocked msg, emits original order
    kp['bm'] = raw['bm'][None, :]
    # BN(eval) fold: scale*(cat@w1^T + b1) + shift == cat@(w1^T*bn_s) + (b1*bn_s + shift)
    bn_s = raw['bn_gamma'] / jnp.sqrt(raw['bn_var'] + BN_EPS)
    w1 = raw['w1'].T * bn_s[None, :]                                 # (2D, 2D)
    kp['w1x'] = w1[:D, :]
    kp['w1m'] = w1[D:, :]
    kp['s1'] = (raw['b1'] * bn_s + raw['bn_beta'] - raw['bn_mean'] * bn_s)[None, :]
    kp['w2'] = raw['w2'].T
    kp['b2'] = raw['b2'][None, :]
    return kp


def stack_layer_params(layers_kp):
    return {name: jnp.stack([kp[name] for kp in layers_kp], axis=0)
            for name in _PARAM_ORDER}


# ------------------------------------------------------------------- pure-JAX reference
def _ref_propagation(x, src, raw, H):
    B, N, D = x.shape
    dm = D // H
    P = lax.Precision.HIGHEST

    def conv(t, W, b):
        return jnp.einsum('bnd,od->bno', t, W, precision=P) + b

    q = conv(x, raw['wq'], raw['bq'])
    k = conv(src, raw['wk'], raw['bk'])
    v = conv(src, raw['wv'], raw['bv'])

    def split(t):  # channel c = d*H + h -> (B, N, H, dm)
        return t.reshape(B, N, dm, H).transpose(0, 1, 3, 2)

    qh, kh, vh = split(q), split(k), split(v)
    scores = jnp.einsum('bnhd,bmhd->bhnm', qh, kh, precision=P) / math.sqrt(dm)
    prob = jax.nn.softmax(scores, axis=-1)
    mh = jnp.einsum('bhnm,bmhd->bnhd', prob, vh, precision=P)
    msg = mh.transpose(0, 1, 3, 2).reshape(B, N, D)     # back to c = d*H + h
    msg = conv(msg, raw['wm'], raw['bm'])

    cat = jnp.concatenate([x, msg], axis=-1)
    h1 = conv(cat, raw['w1'], raw['b1'])
    h1 = (h1 - raw['bn_mean']) / jnp.sqrt(raw['bn_var'] + BN_EPS) * raw['bn_gamma'] + raw['bn_beta']
    h1 = jnp.maximum(h1, 0.0)
    delta = conv(h1, raw['w2'], raw['b2'])
    return x + delta


def _ref_gnn(desc0, desc1, layers_raw, names, H):
    for raw, name in zip(layers_raw, names):
        src0, src1 = (desc1, desc0) if name == 'cross' else (desc0, desc1)
        n0 = _ref_propagation(desc0, src0, raw, H)
        n1 = _ref_propagation(desc1, src1, raw, H)
        desc0, desc1 = n0, n1
    return desc0, desc1


# ----------------------------------------------------------------------------- main
if __name__ == "__main__":
    B, N, D = 2, 16, 32                 # feature_dim=32, 4 heads -> head dim 8
    layer_names = ['self', 'cross', 'self', 'cross']

    key = jax.random.PRNGKey(0)
    k0, k1, *lkeys = jax.random.split(key, 2 + len(layer_names))
    desc0 = jax.random.normal(k0, (B, N, D), jnp.float32)
    desc1 = jax.random.normal(k1, (B, N, D), jnp.float32)

    layers_raw = [init_layer_params(lk, D, NUM_HEADS) for lk in lkeys]
    layers_kp = [to_kernel_params(raw, D, NUM_HEADS) for raw in layers_raw]
    params = stack_layer_params(layers_kp)
    hmask, gbias = build_masks(B, N, D, NUM_HEADS, layer_names)

    gnn = jax.jit(attentional_gnn)
    out0, out1 = gnn(desc0, desc1, params, hmask, gbias)
    out0 = jax.block_until_ready(out0)
    out1 = jax.block_until_ready(out1)

    ref0, ref1 = _ref_gnn(desc0, desc1, layers_raw, layer_names, NUM_HEADS)
    # Exact softmax (no approx reciprocal) -> tolerance tightened vs. previous version;
    # residual error is BN-fold / matmul reassociation in f32.
    np.testing.assert_allclose(np.asarray(out0), np.asarray(ref0), rtol=2e-3, atol=2e-3)
    np.testing.assert_allclose(np.asarray(out1), np.asarray(ref1), rtol=2e-3, atol=2e-3)

    print("KERNEL_OK")
</pallas_src>

<mosaic_0001>
module attributes {stable_mosaic.version = 11 : i64} {
  func.func @_gnn_kernel(%arg0: i32, %arg1: memref<2x2x16x32xf32, #tpu.memory_space<vmem>>, %arg2: memref<4x32xf32, #tpu.memory_space<vmem>>, %arg3: memref<1x64x64xf32, #tpu.memory_space<vmem>>, %arg4: memref<1x32x96xf32, #tpu.memory_space<vmem>>, %arg5: memref<1x1x96xf32, #tpu.memory_space<vmem>>, %arg6: memref<1x32x32xf32, #tpu.memory_space<vmem>>, %arg7: memref<1x1x32xf32, #tpu.memory_space<vmem>>, %arg8: memref<1x32x64xf32, #tpu.memory_space<vmem>>, %arg9: memref<1x32x64xf32, #tpu.memory_space<vmem>>, %arg10: memref<1x1x64xf32, #tpu.memory_space<vmem>>, %arg11: memref<1x64x32xf32, #tpu.memory_space<vmem>>, %arg12: memref<1x1x32xf32, #tpu.memory_space<vmem>>, %arg13: memref<2x2x16x32xf32, #tpu.memory_space<vmem>>, %arg14: memref<2x2x16x32xf32, #tpu.memory_space<vmem>>) attributes {dimension_semantics = [#tpu.dimension_semantics<arbitrary>], iteration_bounds = array<i64: 4>, scalar_prefetch = 0 : i64, scratch_operands = 1 : i64, tpu.core_type = #tpu.core_type<tc>, window_params = [{pipeline_mode = #tpu.pipeline_mode<synchronous>, transform_indices = @transform_0, window_bounds = array<i64: 2, 2, 16, 32>}, {pipeline_mode = #tpu.pipeline_mode<synchronous>, transform_indices = @transform_1, window_bounds = array<i64: 4, 32>}, {transform_indices = @transform_2, window_bounds = array<i64: 1, 64, 64>}, {transform_indices = @transform_3, window_bounds = array<i64: 1, 32, 96>}, {transform_indices = @transform_4, window_bounds = array<i64: 1, 1, 96>}, {transform_indices = @transform_5, window_bounds = array<i64: 1, 32, 32>}, {transform_indices = @transform_6, window_bounds = array<i64: 1, 1, 32>}, {transform_indices = @transform_7, window_bounds = array<i64: 1, 32, 64>}, {transform_indices = @transform_8, window_bounds = array<i64: 1, 32, 64>}, {transform_indices = @transform_9, window_bounds = array<i64: 1, 1, 64>}, {transform_indices = @transform_10, window_bounds = array<i64: 1, 64, 32>}, {transform_indices = @transform_11, window_bounds = array<i64: 1, 1, 32>}, {pipeline_mode = #tpu.pipeline_mode<synchronous>, transform_indices = @transform_12, window_bounds = array<i64: 2, 2, 16, 32>}]} {
    %c0_i32 = arith.constant 0 : i32
    %0 = arith.cmpi eq, %arg0, %c0_i32 : i32
    %1 = arith.extui %0 : i1 to i32
    %c0_i32_0 = arith.constant 0 : i32
    %2 = arith.cmpi ne, %1, %c0_i32_0 : i32
    scf.if %2 {
      %c0_51 = arith.constant 0 : index
      %c0_52 = arith.constant 0 : index
      %c0_53 = arith.constant 0 : index
      %c0_54 = arith.constant 0 : index
      %78 = vector.load %arg1[%c0_51, %c0_52, %c0_53, %c0_54] : memref<2x2x16x32xf32, #tpu.memory_space<vmem>>, vector<2x2x16x32xf32>
      %c0_55 = arith.constant 0 : index
      %c0_56 = arith.constant 0 : index
      %c0_57 = arith.constant 0 : index
      %c0_58 = arith.constant 0 : index
      %79 = vector.load %arg14[%c0_55, %c0_56, %c0_57, %c0_58] : memref<2x2x16x32xf32, #tpu.memory_space<vmem>>, vector<2x2x16x32xf32>
      tpu.vector_store %arg14[%c0_55, %c0_56, %c0_57, %c0_58], %78 {strides = array<i32>} : memref<2x2x16x32xf32, #tpu.memory_space<vmem>>, vector<2x2x16x32xf32>,
    } else {
    }
    %c0 = arith.constant 0 : index
    %c0_1 = arith.constant 0 : index
    %c0_2 = arith.constant 0 : index
    %c0_3 = arith.constant 0 : index
    %3 = vector.load %arg14[%c0, %c0_1, %c0_2, %c0_3] : memref<2x2x16x32xf32, #tpu.memory_space<vmem>>, vector<2x2x16x32xf32>
    %4 = vector.shape_cast %3 : vector<2x2x16x32xf32> to vector<64x32xf32>
    %c0_4 = arith.constant 0 : index
    %c0_5 = arith.constant 0 : index
    %c0_6 = arith.constant 0 : index
    %5 = vector.load %arg4[%c0_4, %c0_5, %c0_6] : memref<1x32x96xf32, #tpu.memory_space<vmem>>, vector<1x32x96xf32>
    %6 = vector.shape_cast %5 : vector<1x32x96xf32> to vector<32x96xf32>
    %cst = arith.constant dense<0.000000e+00> : vector<64x96xf32>
    %7 = tpu.matmul %4, %6, %cst {dimension_numbers = #tpu.dot_dimension_numbers<[1], [0], [0], [1], [0, 0, 1, 1], [], []>} : vector<64x32xf32>, vector<32x96xf32>, vector<64x96xf32> -> vector<64x96xf32>
    %c0_7 = arith.constant 0 : index
    %c0_8 = arith.constant 0 : index
    %c0_9 = arith.constant 0 : index
    %8 = vector.load %arg5[%c0_7, %c0_8, %c0_9] : memref<1x1x96xf32, #tpu.memory_space<vmem>>, vector<1x1x96xf32>
    %9 = vector.shape_cast %8 : vector<1x1x96xf32> to vector<1x96xf32>
    %10 = vector.broadcast %9 : vector<1x96xf32> to vector<64x96xf32>
    %11 = arith.addf %7, %10 : vector<64x96xf32>
    %12 = vector.extract_strided_slice %11 {offsets = [0, 0], sizes = [64, 32], strides = [1, 1]} : vector<64x96xf32> to vector<64x32xf32>
    %13 = vector.extract_strided_slice %11 {offsets = [0, 32], sizes = [64, 32], strides = [1, 1]} : vector<64x96xf32> to vector<64x32xf32>
    %14 = vector.extract_strided_slice %11 {offsets = [0, 64], sizes = [64, 32], strides = [1, 1]} : vector<64x96xf32> to vector<64x32xf32>
    %c0_10 = arith.constant 0 : index
    %c0_11 = arith.constant 0 : index
    %15 = vector.load %arg2[%c0_10, %c0_11] : memref<4x32xf32, #tpu.memory_space<vmem>>, vector<4x32xf32>
    %16 = vector.shape_cast %12 : vector<64x32xf32> to vector<1x64x32xf32>
    %17 = vector.shape_cast %15 : vector<4x32xf32> to vector<4x1x32xf32>
    %18 = vector.broadcast %16 : vector<1x64x32xf32> to vector<4x64x32xf32>
    %19 = vector.broadcast %17 : vector<4x1x32xf32> to vector<4x64x32xf32>
    %20 = arith.mulf %18, %19 : vector<4x64x32xf32>
    %21 = vector.shape_cast %20 : vector<4x64x32xf32> to vector<256x32xf32>
    %cst_12 = arith.constant dense<0.000000e+00> : vector<256x64xf32>
    %22 = tpu.matmul %21, %13, %cst_12 {dimension_numbers = #tpu.dot_dimension_numbers<[1], [1], [0], [0], [0, 0, 1, 0], [], []>} : vector<256x32xf32>, vector<64x32xf32>, vector<256x64xf32> -> vector<256x64xf32>
    %23 = vector.shape_cast %22 : vector<256x64xf32> to vector<4x64x64xf32>
    %c0_13 = arith.constant 0 : index
    %c0_14 = arith.constant 0 : index
    %c0_15 = arith.constant 0 : index
    %24 = vector.load %arg3[%c0_13, %c0_14, %c0_15] : memref<1x64x64xf32, #tpu.memory_space<vmem>>, vector<1x64x64xf32>
    %25 = vector.shape_cast %24 : vector<1x64x64xf32> to vector<64x64xf32>
    %26 = vector.shape_cast %25 : vector<64x64xf32> to vector<1x64x64xf32>
    %27 = vector.broadcast %26 : vector<1x64x64xf32> to vector<4x64x64xf32>
    %28 = arith.addf %23, %27 : vector<4x64x64xf32>
    %cst_16 = arith.constant dense<0xFF800000> : vector<4x64xf32>
    %29 = vector.multi_reduction <maximumf>, %28, %cst_16 [2] : vector<4x64x64xf32> to vector<4x64xf32>
    %30 = vector.shape_cast %29 : vector<4x64xf32> to vector<4x64x1xf32>
    %31 = vector.broadcast %30 : vector<4x64x1xf32> to vector<4x64x64xf32>
    %32 = arith.subf %28, %31 : vector<4x64x64xf32>
    %33 = math.exp %32 : vector<4x64x64xf32>
    %cst_17 = arith.constant dense<0.000000e+00> : vector<4x64xf32>
    %34 = vector.multi_reduction <add>, %33, %cst_17 [2] : vector<4x64x64xf32> to vector<4x64xf32>
    %35 = vector.shape_cast %34 : vector<4x64xf32> to vector<4x64x1xf32>
    %36 = vector.broadcast %35 : vector<4x64x1xf32> to vector<4x64x64xf32>
    %37 = arith.divf %33, %36 : vector<4x64x64xf32>
    %38 = vector.shape_cast %37 : vector<4x64x64xf32> to vector<256x64xf32>
    %cst_18 = arith.constant dense<0.000000e+00> : vector<256x32xf32>
    %39 = tpu.matmul %38, %14, %cst_18 {dimension_numbers = #tpu.dot_dimension_numbers<[1], [0], [0], [1], [0, 0, 1, 1], [], []>} : vector<256x64xf32>, vector<64x32xf32>, vector<256x32xf32> -> vector<256x32xf32>
    %40 = vector.shape_cast %39 : vector<256x32xf32> to vector<4x64x32xf32>
    %41 = vector.shape_cast %15 : vector<4x32xf32> to vector<4x1x32xf32>
    %42 = vector.broadcast %41 : vector<4x1x32xf32> to vector<4x64x32xf32>
    %43 = arith.mulf %40, %42 : vector<4x64x32xf32>
    %cst_19 = arith.constant dense<0.000000e+00> : vector<64x32xf32>
    %44 = vector.multi_reduction <add>, %43, %cst_19 [0] : vector<4x64x32xf32> to vector<64x32xf32>
    %c0_20 = arith.constant 0 : index
    %c0_21 = arith.constant 0 : index
    %c0_22 = arith.constant 0 : index
    %45 = vector.load %arg6[%c0_20, %c0_21, %c0_22] : memref<1x32x32xf32, #tpu.memory_space<vmem>>, vector<1x32x32xf32>
    %46 = vector.shape_cast %45 : vector<1x32x32xf32> to vector<32x32xf32>
    %cst_23 = arith.constant dense<0.000000e+00> : vector<64x32xf32>
    %47 = tpu.matmul %44, %46, %cst_23 {dimension_numbers = #tpu.dot_dimension_numbers<[1], [0], [0], [1], [0, 0, 1, 1], [], []>} : vector<64x32xf32>, vector<32x32xf32>, vector<64x32xf32> -> vector<64x32xf32>
    %c0_24 = arith.constant 0 : index
    %c0_25 = arith.constant 0 : index
    %c0_26 = arith.constant 0 : index
    %48 = vector.load %arg7[%c0_24, %c0_25, %c0_26] : memref<1x1x32xf32, #tpu.memory_space<vmem>>, vector<1x1x32xf32>
    %49 = vector.shape_cast %48 : vector<1x1x32xf32> to vector<1x32xf32>
    %50 = vector.broadcast %49 : vector<1x32xf32> to vector<64x32xf32>
    %51 = arith.addf %47, %50 : vector<64x32xf32>
    %c0_27 = arith.constant 0 : index
    %c0_28 = arith.constant 0 : index
    %c0_29 = arith.constant 0 : index
    %52 = vector.load %arg8[%c0_27, %c0_28, %c0_29] : memref<1x32x64xf32, #tpu.memory_space<vmem>>, vector<1x32x64xf32>
    %53 = vector.shape_cast %52 : vector<1x32x64xf32> to vector<32x64xf32>
    %cst_30 = arith.constant dense<0.000000e+00> : vector<64x64xf32>
    %54 = tpu.matmul %4, %53, %cst_30 {dimension_numbers = #tpu.dot_dimension_numbers<[1], [0], [0], [1], [0, 0, 1, 1], [], []>} : vector<64x32xf32>, vector<32x64xf32>, vector<64x64xf32> -> vector<64x64xf32>
    %c0_31 = arith.constant 0 : index
    %c0_32 = arith.constant 0 : index
    %c0_33 = arith.constant 0 : index
    %55 = vector.load %arg9[%c0_31, %c0_32, %c0_33] : memref<1x32x64xf32, #tpu.memory_space<vmem>>, vector<1x32x64xf32>
    %56 = vector.shape_cast %55 : vector<1x32x64xf32> to vector<32x64xf32>
    %cst_34 = arith.constant dense<0.000000e+00> : vector<64x64xf32>
    %57 = tpu.matmul %51, %56, %cst_34 {dimension_numbers = #tpu.dot_dimension_numbers<[1], [0], [0], [1], [0, 0, 1, 1], [], []>} : vector<64x32xf32>, vector<32x64xf32>, vector<64x64xf32> -> vector<64x64xf32>
    %58 = arith.addf %54, %57 : vector<64x64xf32>
    %c0_35 = arith.constant 0 : index
    %c0_36 = arith.constant 0 : index
    %c0_37 = arith.constant 0 : index
    %59 = vector.load %arg10[%c0_35, %c0_36, %c0_37] : memref<1x1x64xf32, #tpu.memory_space<vmem>>, vector<1x1x64xf32>
    %60 = vector.shape_cast %59 : vector<1x1x64xf32> to vector<1x64xf32>
    %61 = vector.broadcast %60 : vector<1x64xf32> to vector<64x64xf32>
    %62 = arith.addf %58, %61 : vector<64x64xf32>
    %cst_38 = arith.constant 0.000000e+00 : f32
    %63 = vector.broadcast %cst_38 : f32 to vector<64x64xf32>
    %64 = arith.maximumf %62, %63 : vector<64x64xf32>
    %c0_39 = arith.constant 0 : index
    %c0_40 = arith.constant 0 : index
    %c0_41 = arith.constant 0 : index
    %65 = vector.load %arg11[%c0_39, %c0_40, %c0_41] : memref<1x64x32xf32, #tpu.memory_space<vmem>>, vector<1x64x32xf32>
    %66 = vector.shape_cast %65 : vector<1x64x32xf32> to vector<64x32xf32>
    %cst_42 = arith.constant dense<0.000000e+00> : vector<64x32xf32>
    %67 = tpu.matmul %64, %66, %cst_42 {dimension_numbers = #tpu.dot_dimension_numbers<[1], [0], [0], [1], [0, 0, 1, 1], [], []>} : vector<64x64xf32>, vector<64x32xf32>, vector<64x32xf32> -> vector<64x32xf32>
    %c0_43 = arith.constant 0 : index
    %c0_44 = arith.constant 0 : index
    %c0_45 = arith.constant 0 : index
    %68 = vector.load %arg12[%c0_43, %c0_44, %c0_45] : memref<1x1x32xf32, #tpu.memory_space<vmem>>, vector<1x1x32xf32>
    %69 = vector.shape_cast %68 : vector<1x1x32xf32> to vector<1x32xf32>
    %70 = vector.broadcast %69 : vector<1x32xf32> to vector<64x32xf32>
    %71 = arith.addf %67, %70 : vector<64x32xf32>
    %72 = arith.addf %4, %71 : vector<64x32xf32>
    %73 = vector.shape_cast %72 : vector<64x32xf32> to vector<2x2x16x32xf32>
    %c0_46 = arith.constant 0 : index
    %c0_47 = arith.constant 0 : index
    %c0_48 = arith.constant 0 : index
    %c0_49 = arith.constant 0 : index
    %74 = vector.load %arg14[%c0_46, %c0_47, %c0_48, %c0_49] : memref<2x2x16x32xf32, #tpu.memory_space<vmem>>, vector<2x2x16x32xf32>
    tpu.vector_store %arg14[%c0_46, %c0_47, %c0_48, %c0_49], %73 {strides = array<i32>} : memref<2x2x16x32xf32, #tpu.memory_space<vmem>>, vector<2x2x16x32xf32>,
    %c3_i32 = arith.constant 3 : i32
    %75 = arith.cmpi eq, %arg0, %c3_i32 : i32
    %76 = arith.extui %75 : i1 to i32
    %c0_i32_50 = arith.constant 0 : i32
    %77 = arith.cmpi ne, %76, %c0_i32_50 : i32
    scf.if %77 {
      %c0_51 = arith.constant 0 : index
      %c0_52 = arith.constant 0 : index
      %c0_53 = arith.constant 0 : index
      %c0_54 = arith.constant 0 : index
      %78 = vector.load %arg13[%c0_51, %c0_52, %c0_53, %c0_54] : memref<2x2x16x32xf32, #tpu.memory_space<vmem>>, vector<2x2x16x32xf32>
      tpu.vector_store %arg13[%c0_51, %c0_52, %c0_53, %c0_54], %73 {strides = array<i32>} : memref<2x2x16x32xf32, #tpu.memory_space<vmem>>, vector<2x2x16x32xf32>,
    } else {
    }
    return
  }
  func.func @transform_0(%arg0: i32) -> (i32, i32, i32, i32) {
    %c0_i32 = arith.constant 0 : i32
    %c0_i32_0 = arith.constant 0 : i32
    %c0_i32_1 = arith.constant 0 : i32
    %c0_i32_2 = arith.constant 0 : i32
    %c0_i32_3 = arith.constant 0 : i32
    return %c0_i32, %c0_i32_0, %c0_i32_1, %c0_i32_2 : i32, i32, i32, i32
  }
  func.func @transform_1(%arg0: i32) -> (i32, i32) {
    %c0_i32 = arith.constant 0 : i32
    %c0_i32_0 = arith.constant 0 : i32
    %c0_i32_1 = arith.constant 0 : i32
    return %c0_i32, %c0_i32_0 : i32, i32
  }
  func.func @transform_2(%arg0: i32) -> (i32, i32, i32) {
    %c0_i32 = arith.constant 0 : i32
    %c0_i32_0 = arith.constant 0 : i32
    %c0_i32_1 = arith.constant 0 : i32
    return %arg0, %c0_i32, %c0_i32_0 : i32, i32, i32
  }
  func.func @transform_3(%arg0: i32) -> (i32, i32, i32) {
    %c0_i32 = arith.constant 0 : i32
    %c0_i32_0 = arith.constant 0 : i32
    %c0_i32_1 = arith.constant 0 : i32
    return %arg0, %c0_i32, %c0_i32_0 : i32, i32, i32
  }
  func.func @transform_4(%arg0: i32) -> (i32, i32, i32) {
    %c0_i32 = arith.constant 0 : i32
    %c0_i32_0 = arith.constant 0 : i32
    %c0_i32_1 = arith.constant 0 : i32
    return %arg0, %c0_i32, %c0_i32_0 : i32, i32, i32
  }
  func.func @transform_5(%arg0: i32) -> (i32, i32, i32) {
    %c0_i32 = arith.constant 0 : i32
    %c0_i32_0 = arith.constant 0 : i32
    %c0_i32_1 = arith.constant 0 : i32
    return %arg0, %c0_i32, %c0_i32_0 : i32, i32, i32
  }
  func.func @transform_6(%arg0: i32) -> (i32, i32, i32) {
    %c0_i32 = arith.constant 0 : i32
    %c0_i32_0 = arith.constant 0 : i32
    %c0_i32_1 = arith.constant 0 : i32
    return %arg0, %c0_i32, %c0_i32_0 : i32, i32, i32
  }
  func.func @transform_7(%arg0: i32) -> (i32, i32, i32) {
    %c0_i32 = arith.constant 0 : i32
    %c0_i32_0 = arith.constant 0 : i32
    %c0_i32_1 = arith.constant 0 : i32
    return %arg0, %c0_i32, %c0_i32_0 : i32, i32, i32
  }
  func.func @transform_8(%arg0: i32) -> (i32, i32, i32) {
    %c0_i32 = arith.constant 0 : i32
    %c0_i32_0 = arith.constant 0 : i32
    %c0_i32_1 = arith.constant 0 : i32
    return %arg0, %c0_i32, %c0_i32_0 : i32, i32, i32
  }
  func.func @transform_9(%arg0: i32) -> (i32, i32, i32) {
    %c0_i32 = arith.constant 0 : i32
    %c0_i32_0 = arith.constant 0 : i32
    %c0_i32_1 = arith.constant 0 : i32
    return %arg0, %c0_i32, %c0_i32_0 : i32, i32, i32
  }
  func.func @transform_10(%arg0: i32) -> (i32, i32, i32) {
    %c0_i32 = arith.constant 0 : i32
    %c0_i32_0 = arith.constant 0 : i32
    %c0_i32_1 = arith.constant 0 : i32
    return %arg0, %c0_i32, %c0_i32_0 : i32, i32, i32
  }
  func.func @transform_11(%arg0: i32) -> (i32, i32, i32) {
    %c0_i32 = arith.constant 0 : i32
    %c0_i32_0 = arith.constant 0 : i32
    %c0_i32_1 = arith.constant 0 : i32
    return %arg0, %c0_i32, %c0_i32_0 : i32, i32, i32
  }
  func.func @transform_12(%arg0: i32) -> (i32, i32, i32, i32) {
    %c0_i32 = arith.constant 0 : i32
    %c0_i32_0 = arith.constant 0 : i32
    %c0_i32_1 = arith.constant 0 : i32
    %c0_i32_2 = arith.constant 0 : i32
    %c0_i32_3 = arith.constant 0 : i32
    return %c0_i32, %c0_i32_0, %c0_i32_1, %c0_i32_2 : i32, i32, i32, i32
  }
}

</mosaic_0001>

<bundles_post_ra>
// kernel: attentional_gnn.1
= control target key start
LH: loop header
LB: loop body
LE: loop exit
PB: predicated region body
PF: predicated region fallthrough
CT: control target
= control target key end

     0   :  { %s4861_s0 = inlined_call_operand.vmem [shape: f32[2,2,16,32], index: 0, kind: input, shape index: {}]   ;;  %s4862_s1 = inlined_call_operand.vmem [shape: f32[4,32], index: 1, kind: input, shape index: {}]   ;;  %s4863_s2 = inlined_call_operand.vmem [shape: f32[4,64,64], index: 2, kind: input, shape index: {}]   ;;  %s4864_s3 = inlined_call_operand.vmem [shape: f32[4,32,96], index: 3, kind: input, shape index: {}]   ;;  %s4865_s4 = inlined_call_operand.vmem [shape: f32[4,1,96], index: 4, kind: input, shape index: {}]   ;;  %s4866_s5 = inlined_call_operand.hbm [shape: f32[4,32,32], index: 5, kind: input, shape index: {}]   ;;  %s4867_s6 = inlined_call_operand.vmem [shape: f32[4,1,32], index: 6, kind: input, shape index: {}]   ;;  %s4868_s7 = inlined_call_operand.hbm [shape: f32[4,32,64], index: 7, kind: input, shape index: {}]   ;;  %s4869_s8 = inlined_call_operand.hbm [shape: f32[4,32,64], index: 8, kind: input, shape index: {}]   ;;  %s4870_s9 = inlined_call_operand.vmem [shape: f32[4,1,64], index: 9, kind: input, shape index: {}]   ;;  %s4871_s10 = inlined_call_operand.vmem [shape: f32[4,64,32], index: 10, kind: input, shape index: {}]   ;;  %s4872_s11 = inlined_call_operand.hbm [shape: f32[4,1,32], index: 11, kind: input, shape index: {}]   ;;  %s4873_s12 = inlined_call_operand.vmem [shape: f32[2,2,16,32], index: 12, kind: output, shape index: {}]  }
   0x1   :  { %4884 = sst [smem:[#allocation16_spill]] %s4861_s0 }
   0x2   :  { %4885 = sst [smem:[#allocation17_spill]] %s4862_s1 }
   0x3   :  { %4886 = sst [smem:[#allocation18_spill]] %s4863_s2 }
   0x4   :  { %4887 = sst [smem:[#allocation19_spill]] %s4866_s5 }
   0x5   :  { %4888 = sst [smem:[#allocation20_spill]] %s4868_s7 }
   0x6   :  { %4889 = sst [smem:[#allocation21_spill]] %s4869_s8 }
   0x7   :  { %4890 = sst [smem:[#allocation22_spill]] %s4870_s9 }
   0x8   :  { %4891 = sst [smem:[#allocation23_spill]] %s4871_s10 }
   0x9   :  { %4892 = sst [smem:[#allocation24_spill]] %s4873_s12 }
   0xa   :  { %17 = vsyncpa [#allocation4], 0 }
   0xb   :  { %19 = vsyncpa [#allocation4 + $0x1], 0 }
   0xc   :  { %20 = vsyncpa [#allocation6], 0 }
   0xd   :  { %22 = vsyncpa [#allocation6 + $0x1], 0 }
   0xe   :  { %23 = vsyncpa [#allocation9], 0 }
   0xf   :  { %25 = vsyncpa [#allocation9 + $0x1], 0  ;;  %s3780_s21 = smov 0   ;;  %s3782_s22 = smov 0  }
  0x10   :  { %s3784_s23 = smov 0   ;;  %s3786_s24 = smov 0  }
  0x11 LB: > { %4893 = sst [smem:[#allocation13_spill]] %s3700_s23  ;;  %s3799_s25 = sadd.s32 4294967295, %s3704_s24   ;;  %s3704_s24 = sphi %s3786_s24, %s4917_s24   ;;  %s3700_s23 = sphi %s3784_s23, %s4919_s23   ;;  %s3696_s22 = sphi %s3782_s22, %s4921_s22   ;;  %s3692_s21 = sphi %s3780_s21, %s4920_s21  }
  0x12   : > { %s3802_s26 = sadd.s32 1, %s3704_s24   ;;  %s158_s28 = sadd.s32 1, %s3700_s23 }
  0x13   : > { %4894 = sst [smem:[#allocation14_spill]] %s3802_s26  ;;  %s155_s27 = ssub.s32 %s3704_s24, %s3802_s26 }
  0x14   : > { %p156_p0 = scmp.eq.s32.totalorder %s155_s27, 0  ;;  %p165_p1 = scmp.ne.s32.totalorder %s3700_s23, %s3696_s22 }
  0x15   : > { %p166_p2 = scmp.eq.s32.totalorder %s3704_s24, 0  ;;  %p171_p3 = scmp.ne.s32.totalorder %s3696_s22, %s3692_s21 }
  0x16   : > { %s3812_s29 = scalar_select %p156_p0, %s3700_s23, %s158_s28  }
  0x17   : > { %p167_p4 = por %p166_p2, %p165_p1  ;;  %p172_p5 = scmp.eq.s32.totalorder %s3799_s25, 0 }
  0x18   : > { %4895 = sst [smem:[#allocation15_spill]] %s3812_s29  ;;  %p3376_p6 = scmp.lt.s32.totalorder %s3704_s24, 4 }
  0x19   : > { %p3816_p7 = por %p172_p5, %p171_p3  ;;  %s3821_s13 = sand.u32 1, %s3700_s23  }
  0x1a   : > { %s3824_s14 = sshll.u32 %s3821_s13, 5  ;;  %s3827_s15 = sshll.u32 %s3704_s24, 9 }
  0x1b   : > { %s4896_s30 = scalar_select %p3816_p7, 1, 0 }
  0x1c   : > { %p3829_p8 = pnand %p3376_p6, %p167_p4  ;;  %s427_s17 = sand.u32 1, %s3704_s24  }
  0x1d   : > { %s4898_s7 = sld [smem:[#allocation20_spill]]  ;;  %s431_s21 = scalar_lea.vmem [#allocation5], %s3824_s14 }
  0x1e   : > { %s438_s27 = sshll.u32 %s431_s21, 4  ;;  %s3845_s28 = scalar_lea.sflag [#allocation6], %s427_s17  ;;  %s3842_s27 = int_to_ptr.vmem [resolvable:$true] %s438_s27 }
  0x1f   : > { %p3851_p12 = pneg %p3829_p8 }
  0x23   : > { %s3838_s20 = scalar_lea.hbm %s4898_s7, %s3827_s15  ;;  %s3555_s21 = scalar_lea.hbm %s4898_s7, 2048 }
  0x24   : > { %s3550_s29 = scalar_lea.hbm %s3838_s20, 512  ;;  %p3556_p1 = scmp.lt.s32.totalorder %s3838_s20, %s4898_s7 }
  0x25   : > { %p3551_p11 = scmp.ne.s32.totalorder %s3838_s20, %s3550_s29  ;;  %p3557_p2 = scmp.lt.s32.totalorder %s3555_s21, %s3550_s29 }
  0x27   : > { %p3553_p13 = pnand %p3851_p12, %p3551_p11  ;;  %p3558_p3 = por %p3557_p2, %p3556_p1 }
  0x29   : > { %p3554_p0 = pneg %p3553_p13 }
  0x2b   : > { %p3559_p4 = pnand %p3558_p3, %p3554_p0 }
  0x2d   : > { %3562 = shalt.err (!%p3559_p4)
}
  0x2e   : > { %s3563_s17 = scalar_lea.vmem %s3842_s27, 512  ;;  %s3706_s1 = smov [#allocation5]  }
  0x2f   : > { %p3564_p5 = scmp.ne.s32.totalorder %s3842_s27, %s3563_s17  ;;  %s3568_s18 = sshll.u32 %s3706_s1, 4  ;;  %s3569_s18 = int_to_ptr.vmem [resolvable:$false] %s3568_s18 }
  0x30   : > { %s3570_s19 = scalar_lea.vmem %s3569_s18, 1024  ;;  %p3571_p13 = scmp.lt.s32.totalorder %s3842_s27, %s3569_s18 }
  0x31   : > { %p3566_p6 = pnand %p3564_p5, %p3851_p12  ;;  %p3572_p9 = scmp.lt.s32.totalorder %s3570_s19, %s3563_s17 }
  0x33   : > { %p3567_p11 = pneg %p3566_p6  ;;  %p3573_p10 = por %p3572_p9, %p3571_p13 }
  0x35   : > { %p3574_p7 = pnand %p3573_p10, %p3567_p11 }
  0x37   : > { %3577 = shalt.err (!%p3574_p7)
}
  0x38   : > { %s4879_s12 = smov 128   ;;  %s4881_s1 = smov 8  }
  0x39   : > { %3369 = dma.hbm_to_vmem [thread:$0]  (!%p3829_p8), %s3838_s20, 512, %s3842_s27, %s3845_s28, %s4879_s12, %s4879_s12, %s4881_s1  }
  0x3a   : > { %p4900_p9 = scmp.lt.s32.totalorder %s3704_s24, 5  ;;  %p4901_p7 = scmp.ge.s32.totalorder %s3704_s24, 1 }
  0x3b   : > { %s4903_s5 = sld [smem:[#allocation19_spill]]  ;;  %s404_s18 = scalar_lea.vmem [#allocation3], %s3824_s14 }
  0x3c   : > { %p3881_p10 = pnand %p4901_p7, %p4900_p9  ;;  %s411_s19 = sshll.u32 %s404_s18, 4  ;;  %s3892_s19 = int_to_ptr.vmem [resolvable:$true] %s411_s19 }
  0x3d   : > { %s4904_s8 = sld [smem:[#allocation21_spill]]  ;;  %s401_s12 = scalar_lea.sflag [#allocation4], %s3821_s13 }
  0x3e   : > { %s4902_s26 = scalar_select %p3881_p10, 1, 0 }
  0x41   : > { %s3889_s17 = scalar_lea.hbm %s4903_s5, %s3827_s15  ;;  %s3583_s0 = scalar_lea.hbm %s4903_s5, 2048 }
  0x42   : > { %s3578_s1 = scalar_lea.hbm %s3889_s17, 512  ;;  %p3584_p3 = scmp.lt.s32.totalorder %s3889_s17, %s4903_s5 }
  0x43   : > { %s3898_s27 = scalar_lea.hbm %s4904_s8, %s3827_s15  ;;  %p3579_p0 = scmp.ne.s32.totalorder %s3889_s17, %s3578_s1 }
  0x44   : > { %p3585_p4 = scmp.lt.s32.totalorder %s3583_s0, %s3578_s1 }
  0x45   : > { %p3581_p1 = pnand %p3579_p0, %p3851_p12 }
  0x46   : > { %p3586_p5 = por %p3585_p4, %p3584_p3 }
  0x47   : > { %p3582_p2 = pneg %p3581_p1 }
  0x49   : > { %p3587_p6 = pnand %p3586_p5, %p3582_p2 }
  0x4b   : > { %3590 = shalt.err (!%p3587_p6)
}
  0x4c   : > { %s3591_s7 = scalar_lea.vmem %s3892_s19, 512  ;;  %s3709_s15 = smov [#allocation3]  }
  0x4d   : > { %p3592_p11 = scmp.ne.s32.totalorder %s3892_s19, %s3591_s7  ;;  %s3596_s18 = sshll.u32 %s3709_s15, 4  ;;  %s3597_s18 = int_to_ptr.vmem [resolvable:$false] %s3596_s18 }
  0x4e   : > { %s3598_s20 = scalar_lea.vmem %s3597_s18, 1024  ;;  %p3599_p7 = scmp.lt.s32.totalorder %s3892_s19, %s3597_s18 }
  0x4f   : > { %p3594_p13 = pnand %p3592_p11, %p3851_p12  ;;  %p3600_p0 = scmp.lt.s32.totalorder %s3598_s20, %s3591_s7 }
  0x51   : > { %p3595_p9 = pneg %p3594_p13  ;;  %p3601_p1 = por %p3600_p0, %p3599_p7 }
  0x53   : > { %p3602_p10 = pnand %p3601_p1, %p3595_p9 }
  0x55   : > { %3605 = shalt.err (!%p3602_p10)
}
  0x56   : > { %s4905_s0 = smov 8   ;;  %s4906_s9 = smov 128  }
  0x57   : > { %3366 = dma.hbm_to_vmem [thread:$0]  (!%p3829_p8), %s3889_s17, 512, %s3892_s19, %s401_s12, %s4906_s9, %s4906_s9, %s4905_s0  }
  0x58   : > { %s452_s10 = scalar_lea.vmem [#allocation7], %s3824_s14  ;;  %s3606_s29 = scalar_lea.hbm %s3898_s27, 512 }
  0x59   : > { %s459_s1 = sshll.u32 %s452_s10, 4  ;;  %p3607_p2 = scmp.ne.s32.totalorder %s3898_s27, %s3606_s29  ;;  %s460_s1 = int_to_ptr.vmem [resolvable:$true] %s459_s1 }
  0x5a   : > { %s3611_s15 = scalar_lea.hbm %s4904_s8, 2048  ;;  %p3612_p4 = scmp.lt.s32.totalorder %s3898_s27, %s4904_s8 }
  0x5b   : > { %p3609_p10 = pnand %p3607_p2, %p3851_p12  ;;  %p3613_p5 = scmp.lt.s32.totalorder %s3611_s15, %s3606_s29 }
  0x5d   : > { %p3610_p3 = pneg %p3609_p10  ;;  %p3614_p6 = por %p3613_p5, %p3612_p4 }
  0x5f   : > { %p3615_p11 = pnand %p3614_p6, %p3610_p3 }
  0x61   : > { %3618 = shalt.err (!%p3615_p11)
}
  0x62   : > { %s3619_s14 = scalar_lea.vmem %s460_s1, 512  ;;  %s3710_s12 = smov [#allocation7]  }
  0x63   : > { %p3620_p13 = scmp.ne.s32.totalorder %s460_s1, %s3619_s14  ;;  %s3624_s17 = sshll.u32 %s3710_s12, 4  ;;  %s3625_s17 = int_to_ptr.vmem [resolvable:$false] %s3624_s17 }
  0x64   : > { %s3626_s19 = scalar_lea.vmem %s3625_s17, 1024  ;;  %p3627_p0 = scmp.lt.s32.totalorder %s460_s1, %s3625_s17 }
  0x65   : > { %p3622_p9 = pnand %p3620_p13, %p3851_p12  ;;  %p3628_p1 = scmp.lt.s32.totalorder %s3626_s19, %s3619_s14 }
  0x67   : > { %p3623_p7 = pneg %p3622_p9  ;;  %p3629_p2 = por %p3628_p1, %p3627_p0 }
  0x69   : > { %p3630_p10 = pnand %p3629_p2, %p3623_p7 }
  0x6b   : > { %3633 = shalt.err (!%p3630_p10)
}
  0x6c   : > { %3372 = dma.hbm_to_vmem [thread:$0]  (!%p3829_p8), %s3898_s27, 512, %s460_s1, %s3845_s28, %s4906_s9, %s4906_s9, %s4905_s0  }
  0x6d   : > { %s2821_s10 = sshll.u32 %s3704_s24, 4  ;;  %s486_s29 = scalar_lea.vmem [#allocation8], %s3821_s13 }
  0x6e   : > { %s493_s21 = sshll.u32 %s486_s29, 4  ;;  %s491_s18 = scalar_lea.hbm %s4872_s11, %s2821_s10  ;;  %s494_s21 = int_to_ptr.vmem [resolvable:$true] %s493_s21 }
  0x6f   : > { %s484_s20 = scalar_lea.sflag [#allocation9], %s3821_s13  ;;  %s3634_s14 = scalar_lea.hbm %s491_s18, 16 }
  0x70   : > { %p3635_p3 = scmp.ne.s32.totalorder %s491_s18, %s3634_s14  ;;  %s3639_s19 = scalar_lea.hbm %s4872_s11, 64 }
  0x71   : > { %p3640_p6 = scmp.lt.s32.totalorder %s491_s18, %s4872_s11  ;;  %p3641_p11 = scmp.lt.s32.totalorder %s3639_s19, %s3634_s14 }
  0x72   : > { %p3637_p4 = pnand %p3635_p3, %p3851_p12 }
  0x73   : > { %p3642_p13 = por %p3641_p11, %p3640_p6 }
  0x74   : > { %p3638_p5 = pneg %p3637_p4 }
  0x76   : > { %p3643_p9 = pnand %p3642_p13, %p3638_p5 }
  0x78   : > { %3646 = shalt.err (!%p3643_p9)
}
  0x79   : > { %s3647_s24 = scalar_lea.vmem %s494_s21, 16  ;;  %s3711_s13 = smov [#allocation8]  }
  0x7a   : > { %p3648_p7 = scmp.ne.s32.totalorder %s494_s21, %s3647_s24  ;;  %s3652_s27 = sshll.u32 %s3711_s13, 4  ;;  %s3653_s27 = int_to_ptr.vmem [resolvable:$false] %s3652_s27 }
  0x7b   : > { %s3654_s0 = scalar_lea.vmem %s3653_s27, 32  ;;  %p3655_p2 = scmp.lt.s32.totalorder %s494_s21, %s3653_s27 }
  0x7c   : > { %p3650_p0 = pnand %p3648_p7, %p3851_p12  ;;  %p3656_p10 = scmp.lt.s32.totalorder %s3654_s0, %s3647_s24 }
  0x7e   : > { %p3651_p1 = pneg %p3650_p0  ;;  %p3657_p3 = por %p3656_p10, %p3655_p2 }
  0x80   : > { %p3658_p4 = pnand %p3657_p3, %p3651_p1 }
  0x82   : > { %3661 = shalt.err (!%p3658_p4)
}
  0x83   : > { %3375 = dma.hbm_to_vmem [thread:$0]  (!%p3829_p8), %s491_s18, 16, %s494_s21, %s484_s20  }
  0x84   : > { %p4907_p5 = scmp.ne.s32.totalorder %s4902_s26, 0 }
  0x85   : > { %s3966_s5 = sand.u32 (!%p4907_p5), 1, %s3696_s22   ;;  %p4908_p12 = scmp.ne.s32.totalorder (!%p4907_p5), %s4896_s30, 0 }
  0x86   : > { %502 = sbr.rel (%p4907_p5) target bundleno = 1907 (0x773), region = 68  ;;  %s2823_s23 = sshll.u32 (!%p4907_p5), %s3966_s5, 5 }
  0x87   : > { %s505_s9 = scalar_lea.sflag (!%p4907_p5), [#allocation4], %s3966_s5  ;;  %s3970_s1 = scalar_lea.vmem (!%p4907_p5), [#allocation3], %s2823_s23 }
  0x8b   : > { %3679 = dma.done.wait (%p4908_p12), %s505_s9, 512  }
  0x8c   : > { %3681 = vsyncadd (%p4908_p12), %s505_s9, 4294966784  ;;  %s513_s16 = sand.u32 1, %s3799_s25   ;;  %s3977_s10 = scalar_lea.vmem [#allocation5], %s2823_s23 }
  0x8d   : > { %s514_s26 = scalar_lea.sflag [#allocation6], %s513_s16 }
  0x8e   : > { %3683 = dma.done.wait (%p4908_p12), %s514_s26, 1024  }
  0x8f   : > { %3685 = vsyncadd (%p4908_p12), %s514_s26, 4294966272  ;;  %s3983_s29 = scalar_lea.vmem [#allocation7], %s2823_s23  ;;  %s532_s21 = scalar_lea.sflag [#allocation9], %s3966_s5 }
  0x90   : > { %3687 = dma.done.wait (%p4908_p12), %s532_s21, 16  }
  0x91   : > { %3689 = vsyncadd (%p4908_p12), %s532_s21, 4294967280  ;;  %p608_p8 = scmp.lt.s32.totalorder %s3799_s25, 3  ;;  %s4909_s2 = sld [smem:[#allocation18_spill]] }
  0x92   : > { %s4910_s21 = sld [smem:[#allocation22_spill]]  ;;  %p2832_p6 = scmp.ne.s32.totalorder %s3799_s25, 0 }
  0x93   : > { %s3993_s15 = scalar_select %p608_p8, %s3799_s25, 3 }
  0x94   : > { %s4912_s30 = sld [smem:[#allocation16_spill]] (!%p2832_p6) }
  0x95   : > { %s2956_s18 = sshll.u32 %s3993_s15, 6  ;;  %s2957_s20 = sshll.u32 %s3993_s15, 5 }
  0x96   : > { %s4005_s28 = scalar_lea.vmem %s4864_s3, %s2957_s20  ;;  %s620_s27 = scalar_lea.vmem %s4865_s4, %s3993_s15 }
  0x97   : > { %s4000_s17 = scalar_lea.vmem %s4909_s2, %s2956_s18  ;;  %s623_s9 = scalar_lea.vmem %s4867_s6, %s3993_s15 }
  0x98   : > { %s626_s7 = scalar_lea.vmem %s4910_s21, %s3993_s15  ;;  %s4911_s2 = sld [smem:[#allocation23_spill]] }
  0x9a   : > { %635 = sbr.rel (%p2832_p6) target bundleno = 164 (0xa4), region = 88 }
  0x9e   : > { %s4022_s8 = scalar_lea.vmem %s4911_s2, %s2956_s18 }
  0x9f   : > { %v636_v0 = vld [vmem:[%s4912_s30] sm:$0xff]  ;;  %vm644_vm0 = vcmask 261120   ;;  %v637_v1 = vld [vmem:[%s4912_s30 + $0x8] sm:$0xff]  ;;  %v638_v2 = vld [vmem:[%s4912_s30 + $0x10] sm:$0xff] }
  0xa0   : > { %645 = vst.msk [vmem:[#allocation2] sm:$0xff] %vm644_vm0, %v636_v0  ;;  %646 = vst.msk [vmem:[#allocation2 + $0x8] sm:$0xff] %vm644_vm0, %v637_v1  ;;  %v639_v3 = vld [vmem:[%s4912_s30 + $0x18] sm:$0xff]  ;;  %v640_v4 = vld [vmem:[%s4912_s30 + $0x20] sm:$0xff] }
  0xa1   : > { %647 = vst.msk [vmem:[#allocation2 + $0x10] sm:$0xff] %vm644_vm0, %v638_v2  ;;  %v641_v5 = vld [vmem:[%s4912_s30 + $0x28] sm:$0xff]  ;;  %648 = vst.msk [vmem:[#allocation2 + $0x18] sm:$0xff] %vm644_vm0, %v639_v3  ;;  %v642_v6 = vld [vmem:[%s4912_s30 + $0x30] sm:$0xff] }
  0xa2   : > { %649 = vst.msk [vmem:[#allocation2 + $0x20] sm:$0xff] %vm644_vm0, %v640_v4  ;;  %650 = vst.msk [vmem:[#allocation2 + $0x28] sm:$0xff] %vm644_vm0, %v641_v5  ;;  %v643_v7 = vld [vmem:[%s4912_s30 + $0x38] sm:$0xff] }
  0xa3   : > { %651 = vst.msk [vmem:[#allocation2 + $0x30] sm:$0xff] %vm644_vm0, %v642_v6  ;;  %652 = vst.msk [vmem:[#allocation2 + $0x38] sm:$0xff] %vm644_vm0, %v643_v7 }
  0xa4 PF: > { %v664_v8 = vld [vmem:[%s4005_s28 + $0x18] sm:$0xff]  ;;  %v663_v9 = vld [vmem:[%s4005_s28 + $0x10] sm:$0xff]  ;;  %vm672_vm1 = vcmask 261120   ;;  %v662_v11 = vld [vmem:[%s4005_s28 + $0x8] sm:$0xff]  ;;  %v3712_v20 = vmov 1966171168   ;;  %v815_v22 = vlaneseq }
  0xa5   : > { %3103 = vmatprep.subr.mxu0 %v664_v8  ;;  %v661_v12 = vld [vmem:[%s4005_s28] sm:$0xff]  ;;  %v813_v21 = vunpack.c.l.s4 %v3712_v20  ;;  %s4913_s0 = sld [smem:[#allocation17_spill]]  ;;  %s3713_s18 = smov 96   ;;  %vm1281_vm2 = vcmask 523264  }
  0xa6   : > { %3104 = vmatpush3.msra.mxu0 %v664_v8  ;;  %v816_v24 = vshrl.u32 %v815_v22, 7  ;;  %v2833_v37 = vld [vmem:[%s620_s27] ss:$0 sm:$0xff]  ;;  %s3714_s27 = smov 64   ;;  %p2950_p11 = scmp.ne.s32.totalorder %s3799_s25, 3 }
  0xa7   : > { %v653_v10 = vld [vmem:[#allocation2] sm:$0xff]  ;;  %3105 = vmatprep.subr.mxu0 %v663_v9  ;;  %v654_v13 = vld [vmem:[#allocation2 + $0x8] sm:$0xff]  ;;  %v814_v23 = vunpack.c.0.s8 %v813_v21  ;;  %s4916_s15 = sld [smem:[#allocation24_spill]] (!%p2950_p11) }
  0xa8   : > { %3111 = vmatprep.mubr.msk.f32.mxu0 %vm672_vm1, %v653_v10  ;;  %3106 = vmatpush3.msra.mxu0 %v663_v9  ;;  %v655_v14 = vld [vmem:[#allocation2 + $0x10] sm:$0xff]  ;;  %v656_v15 = vld [vmem:[#allocation2 + $0x18] sm:$0xff]  ;;  %v830_v31 = vsub.s32 0, %v816_v24 }
  0xa9   : > { %3107 = vmatprep.subr.mxu0 %v662_v11  ;;  %v657_v16 = vld [vmem:[#allocation2 + $0x20] sm:$0xff]  ;;  %v658_v17 = vld [vmem:[#allocation2 + $0x28] sm:$0xff]  ;;  %v817_v27 = vsub.s32 %v814_v23, %v816_v24 }
  0xaa   : > { %3108 = vmatpush3.msra.mxu0 %v662_v11  ;;  %v659_v18 = vld [vmem:[#allocation2 + $0x30] sm:$0xff]  ;;  %v660_v19 = vld [vmem:[#allocation2 + $0x38] sm:$0xff] }
  0xab   : > { %3109 = vmatprep.subr.mxu0 %v661_v12  ;;  %v2842_v25 = vld.sshfl [vmem:[%s4913_s0] sm:$0x33 pattern:$0x75316420] }
  0xac   : > { %3110 = vmatpush3.msra.mxu0 %v661_v12  ;;  %v811_v26 = vcombine.high %v2842_v25, %v2842_v25  ;;  %v818_v28 = vrot.slane %v2842_v25, %v817_v27 }
  0xad   : > { %3112 = vmatmul.mubr.msk.f32.vlgmr.msra.gmra.mxu0 %vm672_vm1, %v654_v13 }
  0xae   : > { %3114 = vmatprep.mubr.msk.f32.mxu0 %vm672_vm1, %v655_v14  ;;  %v825_v29 = vrot.slane %v811_v26, %v817_v27  ;;  %v826_v30 = vcombine.high %v818_v28, %v818_v28  ;;  %v4077_v40 = vrot.slane %v818_v28, %v830_v31 }
  0xb0   : > { %v827_v32 = vcombine.high %v825_v29, %v825_v29  ;;  %v4064_v33 = vrot.slane %v825_v29, %v830_v31  ;;  %v4066_v34 = vrot.slane %v826_v30, %v830_v31 }
  0xb1   : > { %3115 = vmatmul.mubr.msk.f32.gmra.mxu0 %vm672_vm1, %v656_v15 }
  0xb2   : > { %3117 = vmatprep.mubr.msk.f32.mxu0 %vm672_vm1, %v657_v16  ;;  %v4068_v35 = vrot.slane %v827_v32, %v830_v31 }
  0xb5   : > { %3118 = vmatmul.mubr.msk.f32.gmra.mxu0 %vm672_vm1, %v658_v17 }
  0xb6   : > { %3120 = vmatprep.mubr.msk.f32.mxu0 %vm672_vm1, %v659_v18 }
  0xb9   : > { %3121 = vmatmul.mubr.msk.f32.gmra.mxu0 %vm672_vm1, %v660_v19 }
 0x16d   : > { %v3113_v36 = vpop.f32.mrf.mxu0 }
 0x16e   : > { %v4101_v54 = vadd.f32 %v3113_v36, %v2833_v37 }
 0x16f   : > { %v763_v38 = vpop.f32.mrf.mxu0 }
 0x170   : > { %v4075_v39 = vadd.f32 %v2833_v37, %v763_v38  ;;  %v849_v5 = vmul.f32 %v4077_v40, %v4101_v54  ;;  %v857_v13 = vmul.f32 %v4064_v33, %v4101_v54  ;;  %v865_v21 = vmul.f32 %v4066_v34, %v4101_v54 }
 0x171   : > { %v3116_v41 = vpop.f32.mrf.mxu0  ;;  %v873_v29 = vmul.f32 %v4068_v35, %v4101_v54 }
 0x172   : > { %v848_v42 = vmul.f32 %v4077_v40, %v4075_v39  ;;  %v4097_v53 = vadd.f32 %v3116_v41, %v2833_v37  ;;  %v856_v12 = vmul.f32 %v4064_v33, %v4075_v39  ;;  %v864_v20 = vmul.f32 %v4066_v34, %v4075_v39  ;;  %v4226_v41 = vld [vmem:[%s4000_s17 + $0x8] sm:$0xff] }
 0x173   : > { %v773_v43 = vpop.f32.mrf.mxu0  ;;  %v872_v28 = vmul.f32 %v4068_v35, %v4075_v39 }
 0x174   : > { %3139 = vmatprep.mubr.msk.f32.mxu1 %vm672_vm1, %v848_v42  ;;  %v4091_v51 = vadd.f32 %v2833_v37, %v773_v43  ;;  %v851_v7 = vmul.f32 %v4077_v40, %v4097_v53  ;;  %v859_v15 = vmul.f32 %v4064_v33, %v4097_v53  ;;  %v867_v23 = vmul.f32 %v4066_v34, %v4097_v53  ;;  %v4229_v43 = vld [vmem:[%s4000_s17] sm:$0xff] }
 0x175   : > { %v3119_v44 = vpop.f32.mrf.mxu0  ;;  %v875_v31 = vmul.f32 %v4068_v35, %v4097_v53 }
 0x176   : > { %v4082_v45 = vadd.f32 %v3119_v44, %v2833_v37  ;;  %v850_v6 = vmul.f32 %v4077_v40, %v4091_v51  ;;  %v858_v14 = vmul.f32 %v4064_v33, %v4091_v51  ;;  %v866_v22 = vmul.f32 %v4066_v34, %v4091_v51 }
 0x177   : > { %v783_v46 = vpop.f32.mrf.mxu0  ;;  %v874_v30 = vmul.f32 %v4068_v35, %v4091_v51 }
 0x178   : > { %898 = vrot.lane.b32.xlu1 %v4082_v45, %s3713_s18  ;;  %v4085_v48 = vadd.f32 %v2833_v37, %v783_v46  ;;  %v853_v9 = vmul.f32 %v4077_v40, %v4082_v45  ;;  %v861_v17 = vmul.f32 %v4064_v33, %v4082_v45  ;;  %v869_v25 = vmul.f32 %v4066_v34, %v4082_v45  ;;  %v4235_v46 = vld [vmem:[%s4000_s17 + $0x18] sm:$0xff] }
 0x179   : > { %v3122_v47 = vpop.f32.mrf.mxu0  ;;  %v877_v36 = vmul.f32 %v4068_v35, %v4082_v45 }
 0x17a   : > { %v4087_v49 = vadd.f32 %v3122_v47, %v2833_v37  ;;  %v852_v8 = vmul.f32 %v4077_v40, %v4085_v48  ;;  %v860_v16 = vmul.f32 %v4064_v33, %v4085_v48  ;;  %v868_v24 = vmul.f32 %v4066_v34, %v4085_v48 }
 0x17b   : > { %v793_v50 = vpop.f32.mrf.mxu0  ;;  %v876_v32 = vmul.f32 %v4068_v35, %v4085_v48 }
 0x17c   : > { %902 = vrot.lane.b32.xlu0 %v4087_v49, %s3713_s18  ;;  %896 = vrot.lane.b32.xlu1 %v4085_v48, %s3713_s18  ;;  %v4093_v52 = vadd.f32 %v2833_v37, %v793_v50  ;;  %v855_v11 = vmul.f32 %v4077_v40, %v4087_v49  ;;  %v863_v19 = vmul.f32 %v4064_v33, %v4087_v49 }
 0x17d   : > { %v871_v27 = vmul.f32 %v4066_v34, %v4087_v49  ;;  %v879_v38 = vmul.f32 %v4068_v35, %v4087_v49 }
 0x17e   : > { %v854_v10 = vmul.f32 %v4077_v40, %v4093_v52  ;;  %v862_v18 = vmul.f32 %v4064_v33, %v4093_v52  ;;  %v870_v26 = vmul.f32 %v4066_v34, %v4093_v52  ;;  %v878_v37 = vmul.f32 %v4068_v35, %v4093_v52 }
 0x180   : > { %900 = vrot.lane.b32.xlu0 %v4093_v52, %s3713_s18  ;;  %892 = vrot.lane.b32.xlu1 %v4091_v51, %s3713_s18 }
 0x184   : > { %894 = vrot.lane.b32.xlu0 %v4097_v53, %s3713_s18  ;;  %888 = vrot.lane.b32.xlu1 %v4075_v39, %s3713_s18 }
 0x188   : > { %890 = vrot.lane.b32.xlu0 %v4101_v54, %s3713_s18  ;;  %1648 = vrot.lane.b32.xlu1 %v4087_v49, %s3714_s27 }
 0x18c   : > { %1642 = vrot.lane.b32.xlu0 %v4085_v48, %s3714_s27  ;;  %1644 = vrot.lane.b32.xlu1 %v4082_v45, %s3714_s27 }
 0x190   : > { %1638 = vrot.lane.b32.xlu0 %v4091_v51, %s3714_s27  ;;  %1640 = vrot.lane.b32.xlu1 %v4097_v53, %s3714_s27  ;;  %v4248_v53 = vld [vmem:[%s4000_s17 + $0x10] sm:$0xff] }
 0x194   : > { %1646 = vrot.lane.b32.xlu0 %v4093_v52, %s3714_s27 }
 0x1ea   : > { %v899_v55 = vpop.permute.xlu1 %898 }
 0x1ee   : > { %v903_v56 = vpop.permute.xlu0 %902  ;;  %v897_v57 = vpop.permute.xlu1 %896 }
 0x1ef   : > { %3123 = vmatprep.subr.msk.mxu1 %vm672_vm1, %v903_v56 }
 0x1f0   : > { %3124 = vmatpush3.xpose.msk.msra.mxu1 %vm672_vm1, %v903_v56  ;;  %v4251_v56 = vld [vmem:[%s4000_s17 + $0x20] sm:$0xff] }
 0x1f2   : > { %v901_v58 = vpop.permute.xlu0 %900  ;;  %v893_v59 = vpop.permute.xlu1 %892 }
 0x1f3   : > { %3125 = vmatprep.subr.msk.mxu1 %vm672_vm1, %v901_v58 }
 0x1f4   : > { %3126 = vmatpush3.xpose.msk.msra.mxu1 %vm672_vm1, %v901_v58 }
 0x1f5   : > { %3127 = vmatprep.subr.msk.mxu1 %vm672_vm1, %v899_v55 }
 0x1f6   : > { %v895_v60 = vpop.permute.xlu0 %894  ;;  %v889_v61 = vpop.permute.xlu1 %888 }
 0x1f8   : > { %3128 = vmatpush3.xpose.msk.msra.mxu1 %vm672_vm1, %v899_v55 }
 0x1f9   : > { %3129 = vmatprep.subr.msk.mxu1 %vm672_vm1, %v897_v57 }
 0x1fa   : > { %v891_v62 = vpop.permute.xlu0 %890  ;;  %v1649_v63 = vpop.permute.xlu1 %1648 }
 0x1fb   : > { %3187 = vmatprep.subr.mxu0 %v1649_v63 }
 0x1fc   : > { %3130 = vmatpush3.xpose.msk.msra.mxu1 %vm672_vm1, %v897_v57  ;;  %3188 = vmatpush3.msra.mxu0 %v1649_v63  ;;  %v4265_v63 = vld [vmem:[%s4000_s17 + $0x30] sm:$0xff] }
 0x1fd   : > { %3131 = vmatprep.subr.msk.mxu1 %vm672_vm1, %v895_v60 }
 0x1fe   : > { %v1643_v0 = vpop.permute.xlu0 %1642  ;;  %v1645_v2 = vpop.permute.xlu1 %1644 }
 0x200   : > { %3132 = vmatpush3.xpose.msk.msra.mxu1 %vm672_vm1, %v895_v60 }
 0x201   : > { %3133 = vmatprep.subr.msk.mxu1 %vm672_vm1, %v893_v59 }
 0x202   : > { %v1639_v1 = vpop.permute.xlu0 %1638  ;;  %v1641_v4 = vpop.permute.xlu1 %1640 }
 0x204   : > { %3134 = vmatpush3.xpose.msk.msra.mxu1 %vm672_vm1, %v893_v59  ;;  %v4259_v59 = vld [vmem:[%s4000_s17 + $0x28] sm:$0xff] }
 0x205   : > { %3135 = vmatprep.subr.msk.mxu1 %vm672_vm1, %v891_v62 }
 0x206   : > { %v1647_v3 = vpop.permute.xlu0 %1646 }
 0x207   : > { %3189 = vmatprep.subr.mxu0 %v1647_v3 }
 0x208   : > { %3136 = vmatpush3.xpose.msk.msra.mxu1 %vm672_vm1, %v891_v62  ;;  %3190 = vmatpush3.msra.mxu0 %v1647_v3  ;;  %v4275_v3 = vld [vmem:[%s4000_s17 + $0x38] sm:$0xff] }
 0x209   : > { %3137 = vmatprep.subr.msk.mxu1 %vm672_vm1, %v889_v61  ;;  %3191 = vmatprep.subr.mxu0 %v1645_v2 }
 0x20a   : > { %3192 = vmatpush3.msra.mxu0 %v1645_v2 }
 0x20b   : > { %3193 = vmatprep.subr.mxu0 %v1643_v0 }
 0x20c   : > { %3138 = vmatpush3.xpose.msk.msra.mxu1 %vm672_vm1, %v889_v61  ;;  %3194 = vmatpush3.msra.mxu0 %v1643_v0 }
 0x20d   : > { %3195 = vmatprep.subr.mxu0 %v1641_v4 }
 0x20e   : > { %3196 = vmatpush3.msra.mxu0 %v1641_v4 }
 0x20f   : > { %3140 = vmatmul.mubr.msk.f32.vlgmr.msra.gmra.mxu1 %vm672_vm1, %v849_v5  ;;  %3197 = vmatprep.subr.mxu0 %v1639_v1 }
 0x210   : > { %3142 = vmatprep.mubr.msk.f32.mxu1 %vm672_vm1, %v850_v6  ;;  %3198 = vmatpush3.msra.mxu0 %v1639_v1 }
 0x213   : > { %3143 = vmatmul.mubr.msk.f32.gmra.mxu1 %vm672_vm1, %v851_v7 }
 0x214   : > { %3145 = vmatprep.mubr.msk.f32.mxu1 %vm672_vm1, %v852_v8 }
 0x217   : > { %3146 = vmatmul.mubr.msk.f32.gmra.mxu1 %vm672_vm1, %v853_v9 }
 0x218   : > { %3148 = vmatprep.mubr.msk.f32.mxu1 %vm672_vm1, %v854_v10 }
 0x21b   : > { %3149 = vmatmul.mubr.msk.f32.gmra.mxu1 %vm672_vm1, %v855_v11 }
 0x21c   : > { %3151 = vmatprep.mubr.msk.f32.mxu1 %vm672_vm1, %v856_v12 }
 0x21f   : > { %3152 = vmatmul.mubr.msk.f32.gmra.mxu1 %vm672_vm1, %v857_v13 }
 0x220   : > { %3154 = vmatprep.mubr.msk.f32.mxu1 %vm672_vm1, %v858_v14 }
 0x223   : > { %3155 = vmatmul.mubr.msk.f32.gmra.mxu1 %vm672_vm1, %v859_v15 }
 0x224   : > { %3157 = vmatprep.mubr.msk.f32.mxu1 %vm672_vm1, %v860_v16 }
 0x227   : > { %3158 = vmatmul.mubr.msk.f32.gmra.mxu1 %vm672_vm1, %v861_v17 }
 0x228   : > { %3160 = vmatprep.mubr.msk.f32.mxu1 %vm672_vm1, %v862_v18 }
 0x22b   : > { %3161 = vmatmul.mubr.msk.f32.gmra.mxu1 %vm672_vm1, %v863_v19 }
 0x22c   : > { %3163 = vmatprep.mubr.msk.f32.mxu1 %vm672_vm1, %v864_v20 }
 0x22f   : > { %3164 = vmatmul.mubr.msk.f32.gmra.mxu1 %vm672_vm1, %v865_v21 }
 0x230   : > { %3166 = vmatprep.mubr.msk.f32.mxu1 %vm672_vm1, %v866_v22 }
 0x233   : > { %3167 = vmatmul.mubr.msk.f32.gmra.mxu1 %vm672_vm1, %v867_v23 }
 0x234   : > { %3169 = vmatprep.mubr.msk.f32.mxu1 %vm672_vm1, %v868_v24 }
 0x237   : > { %3170 = vmatmul.mubr.msk.f32.gmra.mxu1 %vm672_vm1, %v869_v25 }
 0x238   : > { %3172 = vmatprep.mubr.msk.f32.mxu1 %vm672_vm1, %v870_v26 }
 0x23b   : > { %3173 = vmatmul.mubr.msk.f32.gmra.mxu1 %vm672_vm1, %v871_v27 }
 0x23c   : > { %3175 = vmatprep.mubr.msk.f32.mxu1 %vm672_vm1, %v872_v28 }
 0x23f   : > { %3176 = vmatmul.mubr.msk.f32.gmra.mxu1 %vm672_vm1, %v873_v29 }
 0x240   : > { %3178 = vmatprep.mubr.msk.f32.mxu1 %vm672_vm1, %v874_v30 }
 0x243   : > { %3179 = vmatmul.mubr.msk.f32.gmra.mxu1 %vm672_vm1, %v875_v31 }
 0x244   : > { %3181 = vmatprep.mubr.msk.f32.mxu1 %vm672_vm1, %v876_v32 }
 0x247   : > { %3182 = vmatmul.mubr.msk.f32.gmra.mxu1 %vm672_vm1, %v877_v36 }
 0x248   : > { %3184 = vmatprep.mubr.msk.f32.mxu1 %vm672_vm1, %v878_v37 }
 0x24b   : > { %3185 = vmatmul.mubr.msk.f32.gmra.mxu1 %vm672_vm1, %v879_v38 }
 0x2cf   : > { %v3141_v42 = vpop.f32.mrf.mxu1 }
 0x2d0   : > { %v4232_v44 = vadd.f32 %v3141_v42, %v4226_v41 }
 0x2d1   : > { %v1082_v45 = vpop.f32.mrf.mxu1 }
 0x2d2   : > { %v4238_v47 = vadd.f32 %v4229_v43, %v1082_v45  ;;  %v1285_v48 = vsel %vm1281_vm2, %v4232_v44, -inf }
 0x2d3   : > { %1286 = vmax.xlane.f32.xlu1 %v1285_v48  ;;  %v3144_v49 = vpop.f32.mrf.mxu1 }
 0x2d4   : > { %v4243_v50 = vadd.f32 %v3144_v49, %v4235_v46  ;;  %v1282_v51 = vsel %vm1281_vm2, %v4238_v47, -inf }
 0x2d5   : > { %1283 = vmax.xlane.f32.xlu0 %v1282_v51  ;;  %v1092_v52 = vpop.f32.mrf.mxu1 }
 0x2d6   : > { %v4254_v57 = vadd.f32 %v4248_v53, %v1092_v52  ;;  %v1291_v58 = vsel %vm1281_vm2, %v4243_v50, -inf }
 0x2d7   : > { %v3147_v55 = vpop.f32.mrf.mxu1 }
 0x2d8   : > { %v4268_v0 = vadd.f32 %v3147_v55, %v4259_v59  ;;  %v1288_v1 = vsel %vm1281_vm2, %v4254_v57, -inf }
 0x2d9   : > { %1292 = vmax.xlane.f32.xlu0 %v1291_v58  ;;  %v1102_v60 = vpop.f32.mrf.mxu1 }
 0x2da   : > { %v4262_v61 = vadd.f32 %v4251_v56, %v1102_v60  ;;  %v1297_v8 = vsel %vm1281_vm2, %v4268_v0, -inf }
 0x2db   : > { %v3150_v62 = vpop.f32.mrf.mxu1 }
 0x2dc   : > { %v1294_v2 = vsel %vm1281_vm2, %v4262_v61, -inf  ;;  %v4281_v7 = vadd.f32 %v3150_v62, %v4275_v3 }
 0x2dd   : > { %1289 = vmax.xlane.f32.xlu0 %v1288_v1  ;;  %1295 = vmax.xlane.f32.xlu1 %v1294_v2  ;;  %v1112_v4 = vpop.f32.mrf.mxu1 }
 0x2de   : > { %v4278_v5 = vadd.f32 %v4265_v63, %v1112_v4  ;;  %v1303_v14 = vsel %vm1281_vm2, %v4281_v7, -inf }
 0x2df   : > { %v3153_v6 = vpop.f32.mrf.mxu1 }
 0x2e0   : > { %v1300_v9 = vsel %vm1281_vm2, %v4278_v5, -inf  ;;  %v4291_v13 = vadd.f32 %v3153_v6, %v4226_v41 }
 0x2e1   : > { %1298 = vmax.xlane.f32.xlu0 %v1297_v8  ;;  %1301 = vmax.xlane.f32.xlu1 %v1300_v9  ;;  %v1122_v10 = vpop.f32.mrf.mxu1 }
 0x2e2   : > { %v4288_v11 = vadd.f32 %v4229_v43, %v1122_v10  ;;  %v1309_v20 = vsel %vm1281_vm2, %v4291_v13, -inf }
 0x2e3   : > { %v3156_v12 = vpop.f32.mrf.mxu1 }
 0x2e4   : > { %v1306_v15 = vsel %vm1281_vm2, %v4288_v11, -inf  ;;  %v4301_v19 = vadd.f32 %v3156_v12, %v4235_v46 }
 0x2e5   : > { %1304 = vmax.xlane.f32.xlu0 %v1303_v14  ;;  %1307 = vmax.xlane.f32.xlu1 %v1306_v15  ;;  %v1132_v16 = vpop.f32.mrf.mxu1 }
 0x2e6   : > { %v4298_v17 = vadd.f32 %v4248_v53, %v1132_v16  ;;  %v1315_v26 = vsel %vm1281_vm2, %v4301_v19, -inf }
 0x2e7   : > { %v3159_v18 = vpop.f32.mrf.mxu1 }
 0x2e8   : > { %v1312_v21 = vsel %vm1281_vm2, %v4298_v17, -inf  ;;  %v4311_v25 = vadd.f32 %v3159_v18, %v4259_v59 }
 0x2e9   : > { %1310 = vmax.xlane.f32.xlu0 %v1309_v20  ;;  %1313 = vmax.xlane.f32.xlu1 %v1312_v21  ;;  %v1142_v22 = vpop.f32.mrf.mxu1 }
 0x2ea   : > { %v4308_v23 = vadd.f32 %v4251_v56, %v1142_v22  ;;  %v1321_v32 = vsel %vm1281_vm2, %v4311_v25, -inf }
 0x2eb   : > { %v3162_v24 = vpop.f32.mrf.mxu1 }
 0x2ec   : > { %v1318_v27 = vsel %vm1281_vm2, %v4308_v23, -inf  ;;  %v4321_v31 = vadd.f32 %v3162_v24, %v4275_v3 }
 0x2ed   : > { %1316 = vmax.xlane.f32.xlu0 %v1315_v26  ;;  %1319 = vmax.xlane.f32.xlu1 %v1318_v27  ;;  %v1152_v28 = vpop.f32.mrf.mxu1 }
 0x2ee   : > { %v4318_v29 = vadd.f32 %v4265_v63, %v1152_v28  ;;  %v1327_v48 = vsel %vm1281_vm2, %v4321_v31, -inf }
 0x2ef   : > { %v3165_v30 = vpop.f32.mrf.mxu1 }
 0x2f0   : > { %v1324_v36 = vsel %vm1281_vm2, %v4318_v29, -inf  ;;  %v4331_v45 = vadd.f32 %v3165_v30, %v4226_v41 }
 0x2f1   : > { %1322 = vmax.xlane.f32.xlu0 %v1321_v32  ;;  %1325 = vmax.xlane.f32.xlu1 %v1324_v36  ;;  %v1162_v37 = vpop.f32.mrf.mxu1 }
 0x2f2   : > { %v4328_v38 = vadd.f32 %v4229_v43, %v1162_v37  ;;  %v1333_v60 = vsel %vm1281_vm2, %v4331_v45, -inf }
 0x2f3   : > { %v3168_v42 = vpop.f32.mrf.mxu1 }
 0x2f4   : > { %v1330_v49 = vsel %vm1281_vm2, %v4328_v38, -inf  ;;  %v4341_v58 = vadd.f32 %v3168_v42, %v4235_v46 }
 0x2f5   : > { %1328 = vmax.xlane.f32.xlu0 %v1327_v48  ;;  %1331 = vmax.xlane.f32.xlu1 %v1330_v49  ;;  %v1172_v51 = vpop.f32.mrf.mxu1 }
 0x2f6   : > { %v4338_v52 = vadd.f32 %v4248_v53, %v1172_v51  ;;  %v1339_v8 = vsel %vm1281_vm2, %v4341_v58, -inf }
 0x2f7   : > { %v3171_v55 = vpop.f32.mrf.mxu1 }
 0x2f8   : > { %v1336_v62 = vsel %vm1281_vm2, %v4338_v52, -inf  ;;  %v4351_v6 = vadd.f32 %v3171_v55, %v4259_v59 }
 0x2f9   : > { %1334 = vmax.xlane.f32.xlu0 %v1333_v60  ;;  %1337 = vmax.xlane.f32.xlu1 %v1336_v62  ;;  %v1182_v1 = vpop.f32.mrf.mxu1 }
 0x2fa   : > { %v4348_v2 = vadd.f32 %v4251_v56, %v1182_v1  ;;  %v1345_v16 = vsel %vm1281_vm2, %v4351_v6, -inf }
 0x2fb   : > { %v3174_v4 = vpop.f32.mrf.mxu1 }
 0x2fc   : > { %v1342_v9 = vsel %vm1281_vm2, %v4348_v2, -inf  ;;  %v4361_v15 = vadd.f32 %v3174_v4, %v4275_v3 }
 0x2fd   : > { %1340 = vmax.xlane.f32.xlu0 %v1339_v8  ;;  %1343 = vmax.xlane.f32.xlu1 %v1342_v9  ;;  %v1192_v10 = vpop.f32.mrf.mxu1 }
 0x2fe   : > { %v4358_v12 = vadd.f32 %v4265_v63, %v1192_v10  ;;  %v1351_v26 = vsel %vm1281_vm2, %v4361_v15, -inf }
 0x2ff   : > { %v3177_v14 = vpop.f32.mrf.mxu1 }
 0x300   : > { %v1348_v18 = vsel %vm1281_vm2, %v4358_v12, -inf  ;;  %v4371_v24 = vadd.f32 %v3177_v14, %v4226_v41 }
 0x301   : > { %1346 = vmax.xlane.f32.xlu0 %v1345_v16  ;;  %1349 = vmax.xlane.f32.xlu1 %v1348_v18  ;;  %v1202_v20 = vpop.f32.mrf.mxu1 }
 0x302   : > { %v4368_v21 = vadd.f32 %v4229_v43, %v1202_v20  ;;  %v1357_v41 = vsel %vm1281_vm2, %v4371_v24, -inf }
 0x303   : > { %v3180_v22 = vpop.f32.mrf.mxu1 }
 0x304   : > { %v1354_v27 = vsel %vm1281_vm2, %v4368_v21, -inf  ;;  %v4381_v43 = vadd.f32 %v3180_v22, %v4235_v46 }
 0x305   : > { %1352 = vmax.xlane.f32.xlu0 %v1351_v26  ;;  %1355 = vmax.xlane.f32.xlu1 %v1354_v27  ;;  %v1212_v28 = vpop.f32.mrf.mxu1 }
 0x306   : > { %v4378_v30 = vadd.f32 %v4248_v53, %v1212_v28  ;;  %v1363_v46 = vsel %vm1281_vm2, %v4381_v43, -inf }
 0x307   : > { %v3183_v32 = vpop.f32.mrf.mxu1 }
 0x308   : > { %v1360_v36 = vsel %vm1281_vm2, %v4378_v30, -inf  ;;  %v4391_v53 = vadd.f32 %v3183_v32, %v4259_v59 }
 0x309   : > { %1358 = vmax.xlane.f32.xlu0 %v1357_v41  ;;  %1361 = vmax.xlane.f32.xlu1 %v1360_v36  ;;  %v1222_v37 = vpop.f32.mrf.mxu1 }
 0x30a   : > { %v4388_v42 = vadd.f32 %v4251_v56, %v1222_v37  ;;  %v1369_v56 = vsel %vm1281_vm2, %v4391_v53, -inf }
 0x30b   : > { %v3186_v48 = vpop.f32.mrf.mxu1 }
 0x30c   : > { %v1366_v49 = vsel %vm1281_vm2, %v4388_v42, -inf  ;;  %v4401_v60 = vadd.f32 %v3186_v48, %v4275_v3 }
 0x30d   : > { %1364 = vmax.xlane.f32.xlu0 %v1363_v46  ;;  %1367 = vmax.xlane.f32.xlu1 %v1366_v49  ;;  %v1232_v51 = vpop.f32.mrf.mxu1 }
 0x30e   : > { %v4398_v55 = vadd.f32 %v4265_v63, %v1232_v51  ;;  %v1375_v62 = vsel %vm1281_vm2, %v4401_v60, -inf }
 0x310   : > { %v1372_v59 = vsel %vm1281_vm2, %v4398_v55, -inf }
 0x311   : > { %1370 = vmax.xlane.f32.xlu0 %v1369_v56  ;;  %1373 = vmax.xlane.f32.xlu1 %v1372_v59 }
 0x315   : > { %1376 = vmax.xlane.f32.xlu0 %v1375_v62 }
 0x322   : > { %1636 = vrot.lane.b32.xlu1 %v4101_v54, %s3714_s27 }
 0x32b   : > { %1634 = vrot.lane.b32.xlu0 %v4075_v39, %s3714_s27 }
 0x35c   : > { %v1287_v63 = vpop.xlane.xlu1 %1286 }
 0x35d   : > { %v1379_v3 = vsub.f32 %v4232_v44, %v1287_v63 }
 0x35e   : > { %v1284_v1 = vpop.xlane.xlu0 %1283 }
 0x35f   : > { %v1412_v4 = vmul.f32 1.442695, %v1379_v3  ;;  %v1378_v8 = vsub.f32 %v4238_v47, %v1284_v1 }
 0x361   : > { %3414 = vpow2.f32 %v1412_v4  ;;  %v1410_v9 = vmul.f32 1.442695, %v1378_v8 }
 0x362   : > { %v1293_v10 = vpop.xlane.xlu0 %1292 }
 0x363   : > { %3416 = vpow2.f32 %v1410_v9  ;;  %v1381_v14 = vsub.f32 %v4243_v50, %v1293_v10 }
 0x365   : > { %v1416_v16 = vmul.f32 1.442695, %v1381_v14 }
 0x366   : > { %v1290_v18 = vpop.xlane.xlu0 %1289  ;;  %v1296_v20 = vpop.xlane.xlu1 %1295 }
 0x367   : > { %3418 = vpow2.f32 %v1416_v16  ;;  %v1380_v54 = vsub.f32 %v4254_v57, %v1290_v18  ;;  %v1382_v39 = vsub.f32 %v4262_v61, %v1296_v20 }
 0x369   : > { %v1414_v22 = vmul.f32 1.442695, %v1380_v54  ;;  %v1418_v44 = vmul.f32 1.442695, %v1382_v39 }
 0x36a   : > { %v1299_v26 = vpop.xlane.xlu0 %1298  ;;  %v1302_v27 = vpop.xlane.xlu1 %1301 }
 0x36b   : > { %3420 = vpow2.f32 %v1414_v22  ;;  %v1383_v47 = vsub.f32 %v4268_v0, %v1299_v26  ;;  %v1384_v28 = vsub.f32 %v4278_v5, %v1302_v27 }
 0x36c   : > { %3422 = vpow2.f32 %v1418_v44 }
 0x36d   : > { %v1420_v32 = vmul.f32 1.442695, %v1383_v47  ;;  %v1422_v50 = vmul.f32 1.442695, %v1384_v28 }
 0x36e   : > { %v4420_v41 = vpop.eup %3414  ;;  %v1305_v36 = vpop.xlane.xlu0 %1304 }
 0x36f   : > { %v1308_v37 = vpop.xlane.xlu1 %1307  ;;  %3424 = vpow2.f32 %v1420_v32  ;;  %v1385_v57 = vsub.f32 %v4281_v7, %v1305_v36  ;;  %v1477_v48 = vsel %vm1281_vm2, %v4420_v41, 0.0 }
 0x370   : > { %v1386_v61 = vsub.f32 %v4288_v11, %v1308_v37  ;;  %v4426_v46 = vpop.eup %3416  ;;  %1478 = vadd.xlane.f32.xlu0 %v1477_v48  ;;  %3426 = vpow2.f32 %v1422_v50 }
 0x371   : > { %v1424_v0 = vmul.f32 1.442695, %v1385_v57  ;;  %v1474_v49 = vsel %vm1281_vm2, %v4426_v46, 0.0 }
 0x372   : > { %v1426_v5 = vmul.f32 1.442695, %v1386_v61  ;;  %v1311_v51 = vpop.xlane.xlu0 %1310  ;;  %1475 = vadd.xlane.f32.xlu1 %v1474_v49 }
 0x373   : > { %v1314_v56 = vpop.xlane.xlu1 %1313  ;;  %3428 = vpow2.f32 %v1424_v0  ;;  %v1387_v7 = vsub.f32 %v4291_v13, %v1311_v51 }
 0x374   : > { %v1388_v11 = vsub.f32 %v4298_v17, %v1314_v56  ;;  %v4432_v59 = vpop.eup %3418  ;;  %3430 = vpow2.f32 %v1426_v5 }
 0x375   : > { %v1428_v62 = vmul.f32 1.442695, %v1387_v7  ;;  %v1483_v3 = vsel %vm1281_vm2, %v4432_v59, 0.0 }
 0x376   : > { %v1430_v63 = vmul.f32 1.442695, %v1388_v11  ;;  %v1317_v1 = vpop.xlane.xlu0 %1316  ;;  %1484 = vadd.xlane.f32.xlu0 %v1483_v3 }
 0x377   : > { %v1320_v4 = vpop.xlane.xlu1 %1319  ;;  %3432 = vpow2.f32 %v1428_v62  ;;  %v1389_v8 = vsub.f32 %v4301_v19, %v1317_v1 }
 0x378   : > { %v1390_v9 = vsub.f32 %v4308_v23, %v1320_v4  ;;  %v4438_v10 = vpop.eup %3420  ;;  %3434 = vpow2.f32 %v1430_v63 }
 0x379   : > { %v4440_v13 = vpop.eup %3422  ;;  %v1432_v17 = vmul.f32 1.442695, %v1389_v8  ;;  %v1480_v16 = vsel %vm1281_vm2, %v4438_v10, 0.0 }
 0x37a   : > { %v1434_v14 = vmul.f32 1.442695, %v1390_v9  ;;  %v1323_v18 = vpop.xlane.xlu0 %1322  ;;  %1481 = vadd.xlane.f32.xlu1 %v1480_v16  ;;  %v1486_v23 = vsel %vm1281_vm2, %v4440_v13, 0.0 }
 0x37b   : > { %v1326_v20 = vpop.xlane.xlu1 %1325  ;;  %3436 = vpow2.f32 %v1432_v17  ;;  %v1391_v54 = vsub.f32 %v4311_v25, %v1323_v18 }
 0x37c   : > { %v1392_v19 = vsub.f32 %v4318_v29, %v1326_v20  ;;  %v4446_v39 = vpop.eup %3424  ;;  %3438 = vpow2.f32 %v1434_v14 }
 0x37d   : > { %v1436_v22 = vmul.f32 1.442695, %v1391_v54  ;;  %v1489_v26 = vsel %vm1281_vm2, %v4446_v39, 0.0  ;;  %v4452_v27 = vpop.eup %3426 }
 0x37e   : > { %v1438_v44 = vmul.f32 1.442695, %v1392_v19  ;;  %v1329_v47 = vpop.xlane.xlu0 %1328  ;;  %1490 = vadd.xlane.f32.xlu0 %v1489_v26  ;;  %1487 = vadd.xlane.f32.xlu1 %v1486_v23  ;;  %v1492_v57 = vsel %vm1281_vm2, %v4452_v27, 0.0 }
 0x37f   : > { %v1332_v28 = vpop.xlane.xlu1 %1331  ;;  %3440 = vpow2.f32 %v1436_v22  ;;  %v1393_v25 = vsub.f32 %v4321_v31, %v1329_v47 }
 0x380   : > { %v1394_v29 = vsub.f32 %v4328_v38, %v1332_v28  ;;  %v4456_v32 = vpop.eup %3428  ;;  %3442 = vpow2.f32 %v1438_v44 }
 0x381   : > { %v1440_v50 = vmul.f32 1.442695, %v1393_v25  ;;  %v1495_v37 = vsel %vm1281_vm2, %v4456_v32, 0.0  ;;  %v4462_v61 = vpop.eup %3430 }
 0x382   : > { %v1442_v36 = vmul.f32 1.442695, %v1394_v29  ;;  %v1335_v48 = vpop.xlane.xlu0 %1334  ;;  %1496 = vadd.xlane.f32.xlu0 %v1495_v37  ;;  %1493 = vadd.xlane.f32.xlu1 %v1492_v57  ;;  %v1498_v7 = vsel %vm1281_vm2, %v4462_v61, 0.0 }
 0x383   : > { %v1338_v0 = vpop.xlane.xlu1 %1337  ;;  %3444 = vpow2.f32 %v1440_v50  ;;  %v1395_v31 = vsub.f32 %v4331_v45, %v1335_v48 }
 0x384   : > { %v1396_v38 = vsub.f32 %v4338_v52, %v1338_v0  ;;  %v4466_v5 = vpop.eup %3432  ;;  %3446 = vpow2.f32 %v1442_v36 }
 0x385   : > { %v1444_v49 = vmul.f32 1.442695, %v1395_v31  ;;  %v1501_v56 = vsel %vm1281_vm2, %v4466_v5, 0.0  ;;  %v4472_v11 = vpop.eup %3434 }
 0x386   : > { %v1446_v51 = vmul.f32 1.442695, %v1396_v38  ;;  %v1341_v62 = vpop.xlane.xlu0 %1340  ;;  %1502 = vadd.xlane.f32.xlu0 %v1501_v56  ;;  %1499 = vadd.xlane.f32.xlu1 %v1498_v7  ;;  %v1504_v9 = vsel %vm1281_vm2, %v4472_v11, 0.0 }
 0x387   : > { %v1344_v63 = vpop.xlane.xlu1 %1343  ;;  %3448 = vpow2.f32 %v1444_v49  ;;  %v1397_v45 = vsub.f32 %v4341_v58, %v1341_v62 }
 0x388   : > { %v1398_v52 = vsub.f32 %v4348_v2, %v1344_v63  ;;  %v4476_v3 = vpop.eup %3436  ;;  %3450 = vpow2.f32 %v1446_v51 }
 0x389   : > { %v1448_v1 = vmul.f32 1.442695, %v1397_v45  ;;  %v1507_v8 = vsel %vm1281_vm2, %v4476_v3, 0.0  ;;  %v4482_v17 = vpop.eup %3438 }
 0x38a   : > { %v1450_v4 = vmul.f32 1.442695, %v1398_v52  ;;  %v1347_v14 = vpop.xlane.xlu0 %1346  ;;  %1508 = vadd.xlane.f32.xlu0 %v1507_v8  ;;  %1505 = vadd.xlane.f32.xlu1 %v1504_v9  ;;  %v1510_v22 = vsel %vm1281_vm2, %v4482_v17, 0.0 }
 0x38b   : > { %v1350_v16 = vpop.xlane.xlu1 %1349  ;;  %3452 = vpow2.f32 %v1448_v1  ;;  %v1399_v58 = vsub.f32 %v4351_v6, %v1347_v14 }
 0x38c   : > { %v1400_v2 = vsub.f32 %v4358_v12, %v1350_v16  ;;  %v4486_v18 = vpop.eup %3440  ;;  %3454 = vpow2.f32 %v1450_v4 }
 0x38d   : > { %v4488_v20 = vpop.eup %3442  ;;  %v1452_v54 = vmul.f32 1.442695, %v1399_v58  ;;  %v1513_v23 = vsel %vm1281_vm2, %v4486_v18, 0.0 }
 0x38e   : > { %v1454_v19 = vmul.f32 1.442695, %v1400_v2  ;;  %v1353_v44 = vpop.xlane.xlu0 %1352  ;;  %1514 = vadd.xlane.f32.xlu0 %v1513_v23  ;;  %1511 = vadd.xlane.f32.xlu1 %v1510_v22  ;;  %v1516_v28 = vsel %vm1281_vm2, %v4488_v20, 0.0 }
 0x38f   : > { %v1356_v26 = vpop.xlane.xlu1 %1355  ;;  %3456 = vpow2.f32 %v1452_v54  ;;  %v1401_v6 = vsub.f32 %v4361_v15, %v1353_v44 }
 0x390   : > { %v1402_v12 = vsub.f32 %v4368_v21, %v1356_v26  ;;  %v4496_v47 = vpop.eup %3444  ;;  %3458 = vpow2.f32 %v1454_v19 }
 0x391   : > { %v4500_v25 = vpop.eup %3446  ;;  %v1456_v29 = vmul.f32 1.442695, %v1401_v6  ;;  %v1519_v36 = vsel %vm1281_vm2, %v4496_v47, 0.0 }
 0x392   : > { %v1458_v50 = vmul.f32 1.442695, %v1402_v12  ;;  %v1359_v37 = vpop.xlane.xlu0 %1358  ;;  %1520 = vadd.xlane.f32.xlu0 %v1519_v36  ;;  %1517 = vadd.xlane.f32.xlu1 %v1516_v28  ;;  %v1522_v0 = vsel %vm1281_vm2, %v4500_v25, 0.0 }
 0x393   : > { %v1362_v57 = vpop.xlane.xlu1 %1361  ;;  %3460 = vpow2.f32 %v1456_v29  ;;  %v1403_v15 = vsub.f32 %v4371_v24, %v1359_v37 }
 0x394   : > { %v1404_v21 = vsub.f32 %v4378_v30, %v1362_v57  ;;  %v4506_v48 = vpop.eup %3448  ;;  %3462 = vpow2.f32 %v1458_v50 }
 0x395   : > { %v4510_v31 = vpop.eup %3450  ;;  %v1460_v38 = vmul.f32 1.442695, %v1403_v15  ;;  %v1525_v51 = vsel %vm1281_vm2, %v4506_v48, 0.0 }
 0x396   : > { %v1462_v49 = vmul.f32 1.442695, %v1404_v21  ;;  %v1365_v56 = vpop.xlane.xlu0 %1364  ;;  %1526 = vadd.xlane.f32.xlu0 %v1525_v51  ;;  %1523 = vadd.xlane.f32.xlu1 %v1522_v0  ;;  %v1528_v63 = vsel %vm1281_vm2, %v4510_v31, 0.0 }
 0x397   : > { %v1368_v7 = vpop.xlane.xlu1 %1367  ;;  %3464 = vpow2.f32 %v1460_v38  ;;  %v1405_v24 = vsub.f32 %v4381_v43, %v1365_v56 }
 0x398   : > { %v1406_v30 = vsub.f32 %v4388_v42, %v1368_v7  ;;  %v4516_v62 = vpop.eup %3452  ;;  %3466 = vpow2.f32 %v1462_v49 }
 0x399   : > { %v4520_v45 = vpop.eup %3454  ;;  %v1464_v52 = vmul.f32 1.442695, %v1405_v24  ;;  %v1531_v4 = vsel %vm1281_vm2, %v4516_v62, 0.0 }
 0x39a   : > { %v1466_v1 = vmul.f32 1.442695, %v1406_v30  ;;  %v1371_v8 = vpop.xlane.xlu0 %1370  ;;  %1532 = vadd.xlane.f32.xlu0 %v1531_v4  ;;  %1529 = vadd.xlane.f32.xlu1 %v1528_v63  ;;  %v1534_v16 = vsel %vm1281_vm2, %v4520_v45, 0.0  ;;  %v2070_v30 = vld [vmem:[%s3970_s1 + $0x18] sm:$0xff] }
 0x39b   : > { %v1374_v9 = vpop.xlane.xlu1 %1373  ;;  %3468 = vpow2.f32 %v1464_v52  ;;  %v1407_v43 = vsub.f32 %v4391_v53, %v1371_v8 }
 0x39c   : > { %v1408_v42 = vsub.f32 %v4398_v55, %v1374_v9  ;;  %v4526_v14 = vpop.eup %3456  ;;  %3470 = vpow2.f32 %v1466_v1 }
 0x39d   : > { %v1468_v58 = vmul.f32 1.442695, %v1407_v43  ;;  %v1537_v54 = vsel %vm1281_vm2, %v4526_v14, 0.0  ;;  %v4532_v19 = vpop.eup %3458 }
 0x39e   : > { %v1470_v2 = vmul.f32 1.442695, %v1408_v42  ;;  %1538 = vadd.xlane.f32.xlu0 %v1537_v54  ;;  %v1377_v23 = vpop.xlane.xlu0 %1376  ;;  %1535 = vadd.xlane.f32.xlu1 %v1534_v16  ;;  %v1540_v6 = vsel %vm1281_vm2, %v4532_v19, 0.0 }
 0x39f   : > { %v1637_v22 = vpop.permute.xlu1 %1636  ;;  %3472 = vpow2.f32 %v1468_v58  ;;  %v1409_v53 = vsub.f32 %v4401_v60, %v1377_v23 }
 0x3a0   : > { %3199 = vmatprep.subr.mxu0 %v1637_v22  ;;  %v4535_v55 = vpop.eup %3460  ;;  %3474 = vpow2.f32 %v1470_v2 }
 0x3a1   : > { %3200 = vmatpush3.msra.mxu0 %v1637_v22  ;;  %v1472_v44 = vmul.f32 1.442695, %v1409_v53  ;;  %v1543_v26 = vsel %vm1281_vm2, %v4535_v55, 0.0  ;;  %v4541_v12 = vpop.eup %3462 }
 0x3a2   : > { %1544 = vadd.xlane.f32.xlu0 %v1543_v26  ;;  %v1635_v28 = vpop.permute.xlu0 %1634  ;;  %1541 = vadd.xlane.f32.xlu1 %v1540_v6  ;;  %v1546_v50 = vsel %vm1281_vm2, %v4541_v12, 0.0 }
 0x3a3   : > { %3476 = vpow2.f32 %v1472_v44  ;;  %3201 = vmatprep.subr.mxu0 %v1635_v28 }
 0x3a4   : > { %v4543_v60 = vpop.eup %3464  ;;  %3202 = vmatpush3.msra.mxu0 %v1635_v28 }
 0x3a5   : > { %v1549_v29 = vsel %vm1281_vm2, %v4543_v60, 0.0  ;;  %v4549_v36 = vpop.eup %3466  ;;  %3251 = vmatprep.subr.mxu0 %v2070_v30 }
 0x3a6   : > { %1550 = vadd.xlane.f32.xlu0 %v1549_v29  ;;  %1547 = vadd.xlane.f32.xlu1 %v1546_v50  ;;  %v1552_v15 = vsel %vm1281_vm2, %v4549_v36, 0.0 }
 0x3a8   : > { %v4551_v37 = vpop.eup %3468 }
 0x3a9   : > { %v1555_v57 = vsel %vm1281_vm2, %v4551_v37, 0.0  ;;  %v4557_v21 = vpop.eup %3470 }
 0x3aa   : > { %1556 = vadd.xlane.f32.xlu0 %v1555_v57  ;;  %1553 = vadd.xlane.f32.xlu1 %v1552_v15  ;;  %v1558_v49 = vsel %vm1281_vm2, %v4557_v21, 0.0 }
 0x3ac   : > { %v4559_v0 = vpop.eup %3472 }
 0x3ad   : > { %v1561_v38 = vsel %vm1281_vm2, %v4559_v0, 0.0  ;;  %v4565_v51 = vpop.eup %3474 }
 0x3ae   : > { %1562 = vadd.xlane.f32.xlu0 %v1561_v38  ;;  %1559 = vadd.xlane.f32.xlu1 %v1558_v49  ;;  %v1564_v24 = vsel %vm1281_vm2, %v4565_v51, 0.0 }
 0x3b0   : > { %v4567_v56 = vpop.eup %3476 }
 0x3b1   : > { %v1567_v7 = vsel %vm1281_vm2, %v4567_v56, 0.0 }
 0x3b2   : > { %1568 = vadd.xlane.f32.xlu0 %v1567_v7  ;;  %1565 = vadd.xlane.f32.xlu1 %v1564_v24 }
 0x3f9   : > { %v1479_v63 = vpop.xlane.xlu0 %1478 }
 0x3fa   : > { %3478 = vrcp.f32 %v1479_v63 }
 0x3fb   : > { %v1476_v52 = vpop.xlane.xlu1 %1475 }
 0x3fc   : > { %3480 = vrcp.f32 %v1476_v52 }
 0x3ff   : > { %v1485_v1 = vpop.xlane.xlu0 %1484 }
 0x400   : > { %3482 = vrcp.f32 %v1485_v1 }
 0x403   : > { %v1482_v4 = vpop.xlane.xlu1 %1481 }
 0x404   : > { %3484 = vrcp.f32 %v1482_v4 }
 0x407   : > { %v1491_v8 = vpop.xlane.xlu0 %1490  ;;  %v1488_v9 = vpop.xlane.xlu1 %1487 }
 0x408   : > { %v3479_v43 = vpop.eup %3478  ;;  %3486 = vrcp.f32 %v1491_v8 }
 0x409   : > { %v3481_v42 = vpop.eup %3480  ;;  %3488 = vrcp.f32 %v1488_v9  ;;  %v1573_v58 = vmul.f32 %v3479_v43, %v4420_v41 }
 0x40a   : > { %v1571_v16 = vmul.f32 %v3481_v42, %v4426_v46 }
 0x40b   : > { %v1497_v2 = vpop.xlane.xlu0 %1496  ;;  %v1494_v54 = vpop.xlane.xlu1 %1493 }
 0x40c   : > { %3490 = vrcp.f32 %v1497_v2  ;;  %3203 = vmatprep.mubr.msk.f32.mxu0 %vm1281_vm2, %v1571_v16 }
 0x40d   : > { %3492 = vrcp.f32 %v1494_v54  ;;  %3204 = vmatmul.mubr.msk.f32.vlgmr.msra.gmra.mxu0 %vm1281_vm2, %v1573_v58  ;;  %v3483_v53 = vpop.eup %3482 }
 0x40e   : > { %3252 = vmatpush3.msra.mxu0 %v2070_v30  ;;  %v1577_v41 = vmul.f32 %v3483_v53, %v4432_v59 }
 0x40f   : > { %v1503_v23 = vpop.xlane.xlu0 %1502  ;;  %v1500_v22 = vpop.xlane.xlu1 %1499 }
 0x410   : > { %3494 = vrcp.f32 %v1503_v23 }
 0x411   : > { %v3485_v44 = vpop.eup %3484  ;;  %3496 = vrcp.f32 %v1500_v22 }
 0x412   : > { %v1575_v26 = vmul.f32 %v3485_v44, %v4438_v10 }
 0x413   : > { %v1509_v46 = vpop.xlane.xlu0 %1508  ;;  %v1506_v6 = vpop.xlane.xlu1 %1505 }
 0x414   : > { %3498 = vrcp.f32 %v1509_v46  ;;  %3206 = vmatprep.mubr.msk.f32.mxu0 %vm1281_vm2, %v1575_v26 }
 0x415   : > { %v3487_v28 = vpop.eup %3486  ;;  %3500 = vrcp.f32 %v1506_v6  ;;  %3207 = vmatmul.mubr.msk.f32.gmra.mxu0 %vm1281_vm2, %v1577_v41 }
 0x416   : > { %v3489_v29 = vpop.eup %3488  ;;  %v1581_v50 = vmul.f32 %v3487_v28, %v4446_v39 }
 0x417   : > { %v1515_v57 = vpop.xlane.xlu0 %1514  ;;  %v1512_v15 = vpop.xlane.xlu1 %1511  ;;  %v1579_v38 = vmul.f32 %v3489_v29, %v4440_v13 }
 0x418   : > { %3502 = vrcp.f32 %v1515_v57 }
 0x419   : > { %v3491_v10 = vpop.eup %3490  ;;  %3504 = vrcp.f32 %v1512_v15  ;;  %3209 = vmatprep.mubr.msk.f32.mxu0 %vm1281_vm2, %v1579_v38 }
 0x41a   : > { %v3493_v59 = vpop.eup %3492  ;;  %3210 = vmatmul.mubr.msk.f32.gmra.mxu0 %vm1281_vm2, %v1581_v50  ;;  %v1585_v49 = vmul.f32 %v3491_v10, %v4456_v32 }
 0x41b   : > { %v1521_v7 = vpop.xlane.xlu0 %1520  ;;  %v1518_v24 = vpop.xlane.xlu1 %1517  ;;  %v1583_v30 = vmul.f32 %v3493_v59, %v4452_v27 }
 0x41c   : > { %3506 = vrcp.f32 %v1521_v7 }
 0x41d   : > { %v3495_v39 = vpop.eup %3494  ;;  %3508 = vrcp.f32 %v1518_v24  ;;  %3212 = vmatprep.mubr.msk.f32.mxu0 %vm1281_vm2, %v1583_v30 }
 0x41e   : > { %v3497_v13 = vpop.eup %3496  ;;  %3213 = vmatmul.mubr.msk.f32.gmra.mxu0 %vm1281_vm2, %v1585_v49  ;;  %v1589_v63 = vmul.f32 %v3495_v39, %v4466_v5 }
 0x41f   : > { %v1527_v52 = vpop.xlane.xlu0 %1526  ;;  %v1524_v1 = vpop.xlane.xlu1 %1523  ;;  %v1587_v4 = vmul.f32 %v3497_v13, %v4462_v61 }
 0x420   : > { %3510 = vrcp.f32 %v1527_v52 }
 0x421   : > { %v3499_v32 = vpop.eup %3498  ;;  %3512 = vrcp.f32 %v1524_v1  ;;  %3215 = vmatprep.mubr.msk.f32.mxu0 %vm1281_vm2, %v1587_v4 }
 0x422   : > { %v3501_v27 = vpop.eup %3500  ;;  %3216 = vmatmul.mubr.msk.f32.gmra.mxu0 %vm1281_vm2, %v1589_v63  ;;  %v1593_v8 = vmul.f32 %v3499_v32, %v4476_v3 }
 0x423   : > { %v1533_v9 = vpop.xlane.xlu0 %1532  ;;  %v1530_v43 = vpop.xlane.xlu1 %1529  ;;  %v1591_v42 = vmul.f32 %v3501_v27, %v4472_v11 }
 0x424   : > { %3514 = vrcp.f32 %v1533_v9  ;;  %v2214_v9 = vld [vmem:[%s3983_s29 + $0x18] sm:$0xff] }
 0x425   : > { %v3503_v5 = vpop.eup %3502  ;;  %3516 = vrcp.f32 %v1530_v43  ;;  %3218 = vmatprep.mubr.msk.f32.mxu0 %vm1281_vm2, %v1591_v42  ;;  %3271 = vmatprep.subr.mxu1 %v2214_v9  ;;  %v4644_v43 = vld [vmem:[%s3977_s10 + $0x18] sm:$0xff]  ;;  %v2211_v42 = vld [vmem:[%s3983_s29] sm:$0xff] }
 0x426   : > { %v3505_v61 = vpop.eup %3504  ;;  %3219 = vmatmul.mubr.msk.f32.gmra.mxu0 %vm1281_vm2, %v1593_v8  ;;  %v1597_v16 = vmul.f32 %v3503_v5, %v4486_v18  ;;  %v2067_v8 = vld [vmem:[%s3970_s1] sm:$0xff]  ;;  %3272 = vmatpush3.msra.mxu1 %v2214_v9 }
 0x427   : > { %v1539_v58 = vpop.xlane.xlu0 %1538  ;;  %v1536_v2 = vpop.xlane.xlu1 %1535  ;;  %v1595_v54 = vmul.f32 %v3505_v61, %v4482_v17 }
 0x428   : > { %3518 = vrcp.f32 %v1539_v58 }
 0x429   : > { %v3507_v3 = vpop.eup %3506  ;;  %3520 = vrcp.f32 %v1536_v2  ;;  %3221 = vmatprep.mubr.msk.f32.mxu0 %vm1281_vm2, %v1595_v54 }
 0x42a   : > { %v3509_v11 = vpop.eup %3508  ;;  %3222 = vmatmul.mubr.msk.f32.gmra.mxu0 %vm1281_vm2, %v1597_v16  ;;  %v1601_v23 = vmul.f32 %v3507_v3, %v4496_v47 }
 0x42b   : > { %v1545_v22 = vpop.xlane.xlu0 %1544  ;;  %v1542_v53 = vpop.xlane.xlu1 %1541  ;;  %v1599_v44 = vmul.f32 %v3509_v11, %v4488_v20 }
 0x42c   : > { %3522 = vrcp.f32 %v1545_v22 }
 0x42d   : > { %v3511_v18 = vpop.eup %3510  ;;  %3524 = vrcp.f32 %v1542_v53  ;;  %3224 = vmatprep.mubr.msk.f32.mxu0 %vm1281_vm2, %v1599_v44 }
 0x42e   : > { %v3513_v17 = vpop.eup %3512  ;;  %3225 = vmatmul.mubr.msk.f32.gmra.mxu0 %vm1281_vm2, %v1601_v23  ;;  %v1605_v26 = vmul.f32 %v3511_v18, %v4506_v48 }
 0x42f   : > { %v1551_v46 = vpop.xlane.xlu0 %1550  ;;  %v1548_v6 = vpop.xlane.xlu1 %1547  ;;  %v1603_v41 = vmul.f32 %v3513_v17, %v4500_v25 }
 0x430   : > { %3526 = vrcp.f32 %v1551_v46 }
 0x431   : > { %v3515_v47 = vpop.eup %3514  ;;  %3528 = vrcp.f32 %v1548_v6  ;;  %3227 = vmatprep.mubr.msk.f32.mxu0 %vm1281_vm2, %v1603_v41 }
 0x432   : > { %v3517_v20 = vpop.eup %3516  ;;  %3228 = vmatmul.mubr.msk.f32.gmra.mxu0 %vm1281_vm2, %v1605_v26  ;;  %v1609_v28 = vmul.f32 %v3515_v47, %v4516_v62 }
 0x433   : > { %v1557_v29 = vpop.xlane.xlu0 %1556  ;;  %v1554_v50 = vpop.xlane.xlu1 %1553  ;;  %v1607_v57 = vmul.f32 %v3517_v20, %v4510_v31 }
 0x434   : > { %3530 = vrcp.f32 %v1557_v29 }
 0x435   : > { %v3519_v48 = vpop.eup %3518  ;;  %3532 = vrcp.f32 %v1554_v50  ;;  %3230 = vmatprep.mubr.msk.f32.mxu0 %vm1281_vm2, %v1607_v57 }
 0x436   : > { %v3521_v25 = vpop.eup %3520  ;;  %3231 = vmatmul.mubr.msk.f32.gmra.mxu0 %vm1281_vm2, %v1609_v28  ;;  %v1613_v15 = vmul.f32 %v3519_v48, %v4526_v14 }
 0x437   : > { %v1563_v38 = vpop.xlane.xlu0 %1562  ;;  %v1560_v10 = vpop.xlane.xlu1 %1559  ;;  %v1611_v59 = vmul.f32 %v3521_v25, %v4520_v45 }
 0x438   : > { %3534 = vrcp.f32 %v1563_v38 }
 0x439   : > { %v3523_v62 = vpop.eup %3522  ;;  %3536 = vrcp.f32 %v1560_v10  ;;  %3233 = vmatprep.mubr.msk.f32.mxu0 %vm1281_vm2, %v1611_v59 }
 0x43a   : > { %v3525_v31 = vpop.eup %3524  ;;  %3234 = vmatmul.mubr.msk.f32.gmra.mxu0 %vm1281_vm2, %v1613_v15  ;;  %v1617_v49 = vmul.f32 %v3523_v62, %v4535_v55 }
 0x43b   : > { %v1569_v7 = vpop.xlane.xlu0 %1568  ;;  %v1566_v24 = vpop.xlane.xlu1 %1565  ;;  %v1615_v30 = vmul.f32 %v3525_v31, %v4532_v19 }
 0x43c   : > { %3538 = vrcp.f32 %v1569_v7 }
 0x43d   : > { %v3527_v14 = vpop.eup %3526  ;;  %3540 = vrcp.f32 %v1566_v24  ;;  %3236 = vmatprep.mubr.msk.f32.mxu0 %vm1281_vm2, %v1615_v30 }
 0x43e   : > { %v3529_v45 = vpop.eup %3528  ;;  %3237 = vmatmul.mubr.msk.f32.gmra.mxu0 %vm1281_vm2, %v1617_v49  ;;  %v1621_v39 = vmul.f32 %v3527_v14, %v4543_v60 }
 0x43f   : > { %v1619_v13 = vmul.f32 %v3529_v45, %v4541_v12 }
 0x441   : > { %v3531_v63 = vpop.eup %3530  ;;  %3239 = vmatprep.mubr.msk.f32.mxu0 %vm1281_vm2, %v1619_v13 }
 0x442   : > { %v3533_v55 = vpop.eup %3532  ;;  %3240 = vmatmul.mubr.msk.f32.gmra.mxu0 %vm1281_vm2, %v1621_v39  ;;  %v1625_v19 = vmul.f32 %v3531_v63, %v4551_v37 }
 0x443   : > { %v1623_v52 = vmul.f32 %v3533_v55, %v4549_v36 }
 0x445   : > { %v3535_v1 = vpop.eup %3534  ;;  %3242 = vmatprep.mubr.msk.f32.mxu0 %vm1281_vm2, %v1623_v52 }
 0x446   : > { %v3537_v4 = vpop.eup %3536  ;;  %3243 = vmatmul.mubr.msk.f32.gmra.mxu0 %vm1281_vm2, %v1625_v19  ;;  %v1629_v12 = vmul.f32 %v3535_v1, %v4559_v0  ;;  %v2069_v0 = vld [vmem:[%s3970_s1 + $0x10] sm:$0xff] }
 0x447   : > { %v1627_v60 = vmul.f32 %v3537_v4, %v4557_v21  ;;  %3253 = vmatprep.subr.mxu0 %v2069_v0  ;;  %v2068_v21 = vld [vmem:[%s3970_s1 + $0x8] sm:$0xff] }
 0x448   : > { %3254 = vmatpush3.msra.mxu0 %v2069_v0 }
 0x449   : > { %v3539_v32 = vpop.eup %3538  ;;  %3245 = vmatprep.mubr.msk.f32.mxu0 %vm1281_vm2, %v1627_v60  ;;  %3255 = vmatprep.subr.mxu0 %v2068_v21 }
 0x44a   : > { %v3541_v37 = vpop.eup %3540  ;;  %3246 = vmatmul.mubr.msk.f32.gmra.mxu0 %vm1281_vm2, %v1629_v12  ;;  %v1633_v36 = vmul.f32 %v3539_v32, %v4567_v56  ;;  %v2213_v56 = vld [vmem:[%s3983_s29 + $0x10] sm:$0xff] }
 0x44b   : > { %v1631_v27 = vmul.f32 %v3541_v37, %v4565_v51  ;;  %3256 = vmatpush3.msra.mxu0 %v2068_v21  ;;  %v2212_v51 = vld [vmem:[%s3983_s29 + $0x8] sm:$0xff]  ;;  %3273 = vmatprep.subr.mxu1 %v2213_v56 }
 0x44c   : > { %3257 = vmatprep.subr.mxu0 %v2067_v8  ;;  %3274 = vmatpush3.msra.mxu1 %v2213_v56 }
 0x44d   : > { %3248 = vmatprep.mubr.msk.f32.mxu0 %vm1281_vm2, %v1631_v27  ;;  %3258 = vmatpush3.msra.mxu0 %v2067_v8 }
 0x44e   : > { %3249 = vmatmul.mubr.msk.f32.gmra.mxu0 %vm1281_vm2, %v1633_v36  ;;  %3291 = vmatprep.subr.mxu0 %v4644_v43 }
 0x44f   : > { %3275 = vmatprep.subr.mxu1 %v2212_v51 }
 0x450   : > { %3276 = vmatpush3.msra.mxu1 %v2212_v51 }
 0x451   : > { %3277 = vmatprep.subr.mxu1 %v2211_v42 }
 0x452   : > { %3278 = vmatpush3.msra.mxu1 %v2211_v42 }
 0x4cd   : > { %v3205_v5 = vpop.f32.mrf.mxu0 }
 0x4ce   : > { %v1980_v29 = vmul.f32 %v3205_v5, %v4077_v40 }
 0x4cf   : > { %v1820_v61 = vpop.f32.mrf.mxu0 }
 0x4d0   : > { %v1979_v50 = vmul.f32 %v1820_v61, %v4077_v40  ;;  %v2018_v24 = vsel %vm672_vm1, %v1980_v29, 0.0 }
 0x4d2   : > { %v2011_v30 = vsel %vm672_vm1, %v1979_v50, 0.0 }
 0x4d5   : > { %v3208_v16 = vpop.f32.mrf.mxu0 }
 0x4d6   : > { %v1982_v57 = vmul.f32 %v3208_v16, %v4077_v40 }
 0x4d7   : > { %v1830_v58 = vpop.f32.mrf.mxu0 }
 0x4d8   : > { %v1981_v48 = vmul.f32 %v1830_v58, %v4077_v40  ;;  %v2032_v14 = vsel %vm672_vm1, %v1982_v57, 0.0 }
 0x4da   : > { %v3211_v2 = vpop.f32.mrf.mxu0  ;;  %v2025_v45 = vsel %vm672_vm1, %v1981_v48, 0.0 }
 0x4db   : > { %v1984_v15 = vmul.f32 %v3211_v2, %v4077_v40 }
 0x4dc   : > { %v1840_v54 = vpop.f32.mrf.mxu0 }
 0x4dd   : > { %v1983_v59 = vmul.f32 %v1840_v54, %v4077_v40  ;;  %v2046_v13 = vsel %vm672_vm1, %v1984_v15, 0.0 }
 0x4de   : > { %v3214_v3 = vpop.f32.mrf.mxu0 }
 0x4df   : > { %v2039_v52 = vsel %vm672_vm1, %v1983_v59, 0.0  ;;  %v4672_v1 = vmul.f32 %v3214_v3, %v4077_v40 }
 0x4e0   : > { %v1850_v11 = vpop.f32.mrf.mxu0 }
 0x4e1   : > { %v1985_v0 = vmul.f32 %v1850_v11, %v4077_v40 }
 0x4e2   : > { %v3217_v23 = vpop.f32.mrf.mxu0 }
 0x4e3   : > { %v1988_v38 = vmul.f32 %v3217_v23, %v4064_v33 }
 0x4e4   : > { %v1860_v22 = vpop.f32.mrf.mxu0 }
 0x4e5   : > { %v1987_v10 = vmul.f32 %v1860_v22, %v4064_v33  ;;  %v2019_v63 = vsel %vm672_vm1, %v1988_v38, 0.0 }
 0x4e6   : > { %v3220_v53 = vpop.f32.mrf.mxu0  ;;  %v2020_v21 = vadd.f32 %v2019_v63, %v2018_v24  ;;  %v2208_v24 = vld [vmem:[%s3977_s10 + $0x8] sm:$0xff]  ;;  %v2053_v63 = vsel %vm672_vm1, %v1985_v0, 0.0 }
 0x4e7   : > { %v1990_v62 = vmul.f32 %v3220_v53, %v4064_v33  ;;  %v2012_v55 = vsel %vm672_vm1, %v1987_v10, 0.0 }
 0x4e8   : > { %v1870_v44 = vpop.f32.mrf.mxu0  ;;  %v2013_v8 = vadd.f32 %v2012_v55, %v2011_v30 }
 0x4e9   : > { %v1989_v19 = vmul.f32 %v1870_v44, %v4064_v33  ;;  %v2033_v4 = vsel %vm672_vm1, %v1990_v62, 0.0 }
 0x4ea   : > { %v3223_v18 = vpop.f32.mrf.mxu0  ;;  %v2034_v51 = vadd.f32 %v2033_v4, %v2032_v14 }
 0x4eb   : > { %v1992_v9 = vmul.f32 %v3223_v18, %v4064_v33  ;;  %v2026_v42 = vsel %vm672_vm1, %v1989_v19, 0.0 }
 0x4ec   : > { %v1880_v17 = vpop.f32.mrf.mxu0  ;;  %v2027_v53 = vadd.f32 %v2026_v42, %v2025_v45 }
 0x4ed   : > { %v1991_v5 = vmul.f32 %v1880_v17, %v4064_v33  ;;  %v2047_v44 = vsel %vm672_vm1, %v1992_v9, 0.0 }
 0x4ee   : > { %v4649_v26 = vpop.f32.mrf.mxu0  ;;  %v2048_v30 = vadd.f32 %v2047_v44, %v2046_v13  ;;  %v2915_v44 = vld [vmem:[%s623_s9] ss:$0 sm:$0xff] }
 0x4ef   : > { %v1994_v50 = vmul.f32 %v4649_v26, %v4064_v33 }
 0x4f0   : > { %v1890_v46 = vpop.f32.mrf.mxu0 }
 0x4f1   : > { %v2061_v55 = vsel %vm672_vm1, %v1994_v50, 0.0 }
 0x4f2   : > { %v3229_v6 = vpop.f32.mrf.mxu0 }
 0x4f3   : > { %v1996_v49 = vmul.f32 %v3229_v6, %v4066_v34 }
 0x4f4   : > { %v1900_v41 = vpop.f32.mrf.mxu0 }
 0x4f5   : > { %v1995_v7 = vmul.f32 %v1900_v41, %v4066_v34  ;;  %v2021_v32 = vsel %vm672_vm1, %v1996_v49, 0.0  ;;  %v2040_v41 = vsel %vm672_vm1, %v1991_v5, 0.0  ;;  %v4730_v5 = vld [vmem:[#allocation2] sm:$0xff] }
 0x4f6   : > { %v3232_v47 = vpop.f32.mrf.mxu0  ;;  %v2022_v16 = vadd.f32 %v2021_v32, %v2020_v21 }
 0x4f7   : > { %v1998_v12 = vmul.f32 %v3232_v47, %v4066_v34  ;;  %v2014_v37 = vsel %vm672_vm1, %v1995_v7, 0.0  ;;  %v1993_v47 = vmul.f32 %v1890_v46, %v4064_v33  ;;  %v2041_v33 = vadd.f32 %v2040_v41, %v2039_v52 }
 0x4f8   : > { %v1910_v20 = vpop.f32.mrf.mxu0  ;;  %v2015_v58 = vadd.f32 %v2014_v37, %v2013_v8 }
 0x4f9   : > { %v1997_v36 = vmul.f32 %v1910_v20, %v4066_v34  ;;  %v2035_v2 = vsel %vm672_vm1, %v1998_v12, 0.0  ;;  %v2054_v14 = vsel %vm672_vm1, %v1993_v47, 0.0  ;;  %v2060_v12 = vsel %vm672_vm1, %v4672_v1, 0.0 }
 0x4fa   : > { %v3235_v28 = vpop.f32.mrf.mxu0  ;;  %v2036_v57 = vadd.f32 %v2035_v2, %v2034_v51  ;;  %v4747_v2 = vld [vmem:[#allocation2 + $0x20] sm:$0xff] }
 0x4fb   : > { %v2028_v40 = vsel %vm672_vm1, %v1997_v36, 0.0  ;;  %v2000_v18 = vmul.f32 %v3235_v28, %v4066_v34  ;;  %v2209_v28 = vld [vmem:[%s3977_s10 + $0x10] sm:$0xff] }
 0x4fc   : > { %v1920_v25 = vpop.f32.mrf.mxu0  ;;  %v2029_v48 = vadd.f32 %v2028_v40, %v2027_v53  ;;  %v4759_v40 = vld [vmem:[#allocation2 + $0x38] sm:$0xff] }
 0x4fd   : > { %v1999_v11 = vmul.f32 %v1920_v25, %v4066_v34  ;;  %v2049_v26 = vsel %vm672_vm1, %v2000_v18, 0.0 }
 0x4fe   : > { %v3238_v31 = vpop.f32.mrf.mxu0 }
 0x4ff   : > { %v2042_v38 = vsel %vm672_vm1, %v1999_v11, 0.0  ;;  %v2002_v62 = vmul.f32 %v3238_v31, %v4066_v34  ;;  %v2479_v11 = vld [vmem:[%s4022_s8 + $0x38] sm:$0xff] }
 0x500   : > { %v1930_v39 = vpop.f32.mrf.mxu0  ;;  %v2043_v19 = vadd.f32 %v2042_v38, %v2041_v33  ;;  %3339 = vmatprep.subr.mxu1 %v2479_v11  ;;  %v2474_v33 = vld [vmem:[%s4022_s8 + $0x10] sm:$0xff] }
 0x501   : > { %v2001_v10 = vmul.f32 %v1930_v39, %v4066_v34  ;;  %v2063_v32 = vsel %vm672_vm1, %v2002_v62, 0.0  ;;  %v2472_v62 = vld [vmem:[%s4022_s8] sm:$0xff] }
 0x502   : > { %v3241_v60 = vpop.f32.mrf.mxu0 }
 0x503   : > { %v2004_v27 = vmul.f32 %v3241_v60, %v4068_v35  ;;  %v2056_v31 = vsel %vm672_vm1, %v2001_v10, 0.0  ;;  %v2055_v60 = vadd.f32 %v2054_v14, %v2053_v63 }
 0x504   : > { %v1940_v56 = vpop.f32.mrf.mxu0 }
 0x505   : > { %v2003_v61 = vmul.f32 %v1940_v56, %v4068_v35  ;;  %v2023_v54 = vsel %vm672_vm1, %v2004_v27, 0.0  ;;  %v2062_v27 = vadd.f32 %v2061_v55, %v2060_v12  ;;  %v2057_v8 = vadd.f32 %v2056_v31, %v2055_v60 }
 0x506   : > { %v3244_v3 = vpop.f32.mrf.mxu0  ;;  %v2024_v20 = vadd.f32 %v2023_v54, %v2022_v16  ;;  %v4739_v16 = vld [vmem:[#allocation2 + $0x10] sm:$0xff]  ;;  %v4751_v54 = vld [vmem:[#allocation2 + $0x28] sm:$0xff] }
 0x507   : > { %v2016_v23 = vsel %vm672_vm1, %v2003_v61, 0.0  ;;  %v2006_v22 = vmul.f32 %v3244_v3, %v4068_v35  ;;  %v2064_v56 = vadd.f32 %v2063_v32, %v2062_v27  ;;  %v4735_v61 = vld [vmem:[#allocation2 + $0x8] sm:$0xff]  ;;  %v4755_v3 = vld [vmem:[#allocation2 + $0x30] sm:$0xff] }
 0x508   : > { %v2017_v17 = vadd.f32 %v2016_v23, %v2015_v58  ;;  %v1950_v6 = vpop.f32.mrf.mxu0  ;;  %v4743_v58 = vld [vmem:[#allocation2 + $0x18] sm:$0xff]  ;;  %v2478_v23 = vld [vmem:[%s4022_s8 + $0x30] sm:$0xff] }
 0x509   : > { %v2005_v29 = vmul.f32 %v1950_v6, %v4068_v35  ;;  %v2037_v25 = vsel %vm672_vm1, %v2006_v22, 0.0  ;;  %v2477_v22 = vld [vmem:[%s4022_s8 + $0x28] sm:$0xff] }
 0x50a   : > { %v3247_v15 = vpop.f32.mrf.mxu0  ;;  %3259 = vmatprep.mubr.msk.f32.mxu0 %vm672_vm1, %v2017_v17  ;;  %v2038_v45 = vadd.f32 %v2037_v25, %v2036_v57 }
 0x50b   : > { %v2030_v46 = vsel %vm672_vm1, %v2005_v29, 0.0  ;;  %v2008_v59 = vmul.f32 %v3247_v15, %v4068_v35  ;;  %3260 = vmatmul.mubr.msk.f32.vlgmr.msra.gmra.mxu0 %vm672_vm1, %v2024_v20 }
 0x50c   : > { %v2031_v49 = vadd.f32 %v2030_v46, %v2029_v48  ;;  %v1960_v7 = vpop.f32.mrf.mxu0  ;;  %3292 = vmatpush3.msra.mxu0 %v4644_v43  ;;  %v2050_v43 = vadd.f32 %v2049_v26, %v2048_v30  ;;  %v2476_v46 = vld [vmem:[%s4022_s8 + $0x20] sm:$0xff]  ;;  %v2473_v26 = vld [vmem:[%s4022_s8 + $0x8] sm:$0xff] }
 0x50d   : > { %v2007_v39 = vmul.f32 %v1960_v7, %v4068_v35  ;;  %3293 = vmatprep.subr.mxu0 %v2209_v28  ;;  %v2051_v52 = vsel %vm672_vm1, %v2008_v59, 0.0  ;;  %v2475_v59 = vld [vmem:[%s4022_s8 + $0x18] sm:$0xff]  ;;  %s4915_s8 = scalar_lea.vmem [#allocation8], %s3966_s5 }
 0x50e   : > { %v3250_v34 = vpop.f32.mrf.mxu0  ;;  %3262 = vmatprep.mubr.msk.f32.mxu0 %vm672_vm1, %v2031_v49  ;;  %3294 = vmatpush3.msra.mxu0 %v2209_v28  ;;  %v2052_v0 = vadd.f32 %v2051_v52, %v2050_v43 }
 0x50f   : > { %v2044_v13 = vsel %vm672_vm1, %v2007_v39, 0.0  ;;  %v2010_v4 = vmul.f32 %v3250_v34, %v4068_v35  ;;  %3263 = vmatmul.mubr.msk.f32.gmra.mxu0 %vm672_vm1, %v2038_v45  ;;  %3295 = vmatprep.subr.mxu0 %v2208_v24  ;;  %v2940_v39 = vld [vmem:[%s626_s7] ss:$0 sm:$0xff] }
 0x510   : > { %v2045_v37 = vadd.f32 %v2044_v13, %v2043_v19  ;;  %v1970_v36 = vpop.f32.mrf.mxu0  ;;  %3296 = vmatpush3.msra.mxu0 %v2208_v24 }
 0x511   : > { %v2009_v21 = vmul.f32 %v1970_v36, %v4068_v35  ;;  %v2065_v9 = vsel %vm672_vm1, %v2010_v4, 0.0  ;;  %v2207_v35 = vld [vmem:[%s3977_s10] sm:$0xff] }
 0x512   : > { %3265 = vmatprep.mubr.msk.f32.mxu0 %vm672_vm1, %v2045_v37  ;;  %v2066_v42 = vadd.f32 %v2065_v9, %v2064_v56  ;;  %3297 = vmatprep.subr.mxu0 %v2207_v35 }
 0x513   : > { %v2058_v51 = vsel %vm672_vm1, %v2009_v21, 0.0  ;;  %3266 = vmatmul.mubr.msk.f32.gmra.mxu0 %vm672_vm1, %v2052_v0 }
 0x514   : > { %v2059_v1 = vadd.f32 %v2058_v51, %v2057_v8  ;;  %3298 = vmatpush3.msra.mxu0 %v2207_v35 }
 0x515   : > { %3311 = vmatprep.subr.mxu0 %v2479_v11 }
 0x516   : > { %3268 = vmatprep.mubr.msk.f32.mxu0 %vm672_vm1, %v2059_v1 }
 0x517   : > { %3269 = vmatmul.mubr.msk.f32.gmra.mxu0 %vm672_vm1, %v2066_v42 }
 0x518   : > { %3299 = vmatprep.mubr.msk.f32.mxu0 %vm672_vm1, %v4730_v5 }
 0x51b   : > { %3300 = vmatmul.mubr.msk.f32.vlgmr.msra.gmra.mxu0 %vm672_vm1, %v4735_v61 }
 0x51c   : > { %3302 = vmatprep.mubr.msk.f32.mxu0 %vm672_vm1, %v4739_v16  ;;  %3312 = vmatpush3.msra.mxu0 %v2479_v11 }
 0x51d   : > { %3313 = vmatprep.subr.mxu0 %v2478_v23 }
 0x51e   : > { %3314 = vmatpush3.msra.mxu0 %v2478_v23 }
 0x51f   : > { %3303 = vmatmul.mubr.msk.f32.gmra.mxu0 %vm672_vm1, %v4743_v58  ;;  %3315 = vmatprep.subr.mxu0 %v2477_v22 }
 0x520   : > { %3305 = vmatprep.mubr.msk.f32.mxu0 %vm672_vm1, %v4747_v2  ;;  %3316 = vmatpush3.msra.mxu0 %v2477_v22 }
 0x521   : > { %3317 = vmatprep.subr.mxu0 %v2476_v46 }
 0x522   : > { %3318 = vmatpush3.msra.mxu0 %v2476_v46 }
 0x523   : > { %3306 = vmatmul.mubr.msk.f32.gmra.mxu0 %vm672_vm1, %v4751_v54  ;;  %3319 = vmatprep.subr.mxu0 %v2475_v59 }
 0x524   : > { %3308 = vmatprep.mubr.msk.f32.mxu0 %vm672_vm1, %v4755_v3  ;;  %3320 = vmatpush3.msra.mxu0 %v2475_v59 }
 0x525   : > { %3321 = vmatprep.subr.mxu0 %v2474_v33 }
 0x526   : > { %3322 = vmatpush3.msra.mxu0 %v2474_v33 }
 0x527   : > { %3309 = vmatmul.mubr.msk.f32.gmra.mxu0 %vm672_vm1, %v4759_v40  ;;  %3323 = vmatprep.subr.mxu0 %v2473_v26 }
 0x528   : > { %3324 = vmatpush3.msra.mxu0 %v2473_v26 }
 0x529   : > { %3325 = vmatprep.subr.mxu0 %v2472_v62 }
 0x52a   : > { %3326 = vmatpush3.msra.mxu0 %v2472_v62 }
 0x5cb   : > { %v3261_v53 = vpop.f32.mrf.mxu0 }
 0x5cc   : > { %v2174_v6 = vadd.f32 %v3261_v53, %v2915_v44 }
 0x5cd   : > { %v2168_v18 = vpop.f32.mrf.mxu0 }
 0x5ce   : > { %v2169_v17 = vadd.f32 %v2915_v44, %v2168_v18 }
 0x5cf   : > { %v3264_v41 = vpop.f32.mrf.mxu0 }
 0x5d0   : > { %3279 = vmatprep.mubr.msk.f32.mxu1 %vm672_vm1, %v2169_v17  ;;  %v2184_v29 = vadd.f32 %v3264_v41, %v2915_v44 }
 0x5d1   : > { %v2178_v47 = vpop.f32.mrf.mxu0  ;;  %3280 = vmatmul.mubr.msk.f32.vlgmr.msra.gmra.mxu1 %vm672_vm1, %v2174_v6 }
 0x5d2   : > { %v2179_v20 = vadd.f32 %v2915_v44, %v2178_v47  ;;  %3347 = vmatpush3.msra.mxu1 %v2479_v11 }
 0x5d3   : > { %v3267_v50 = vpop.f32.mrf.mxu0  ;;  %3340 = vmatprep.subr.mxu1 %v2478_v23 }
 0x5d4   : > { %3282 = vmatprep.mubr.msk.f32.mxu1 %vm672_vm1, %v2179_v20  ;;  %3348 = vmatpush3.msra.mxu1 %v2478_v23  ;;  %v2194_v25 = vadd.f32 %v3267_v50, %v2915_v44  ;;  %v2941_v20 = vld [vmem:[%s4915_s8] ss:$0 sm:$0xff] }
 0x5d5   : > { %v2188_v57 = vpop.f32.mrf.mxu0  ;;  %3283 = vmatmul.mubr.msk.f32.gmra.mxu1 %vm672_vm1, %v2184_v29  ;;  %3341 = vmatprep.subr.mxu1 %v2477_v22 }
 0x5d6   : > { %v2189_v48 = vadd.f32 %v2915_v44, %v2188_v57  ;;  %3349 = vmatpush3.msra.mxu1 %v2477_v22 }
 0x5d7   : > { %v3270_v15 = vpop.f32.mrf.mxu0  ;;  %3342 = vmatprep.subr.mxu1 %v2476_v46 }
 0x5d8   : > { %3285 = vmatprep.mubr.msk.f32.mxu1 %vm672_vm1, %v2189_v48  ;;  %v2204_v10 = vadd.f32 %v3270_v15, %v2915_v44  ;;  %3350 = vmatpush3.msra.mxu1 %v2476_v46 }
 0x5d9   : > { %v2198_v28 = vpop.f32.mrf.mxu0  ;;  %3286 = vmatmul.mubr.msk.f32.gmra.mxu1 %vm672_vm1, %v2194_v25  ;;  %3343 = vmatprep.subr.mxu1 %v2475_v59 }
 0x5da   : > { %v2199_v38 = vadd.f32 %v2915_v44, %v2198_v28  ;;  %3351 = vmatpush3.msra.mxu1 %v2475_v59 }
 0x5db   : > { %3344 = vmatprep.subr.mxu1 %v2474_v33  ;;  %v3301_v49 = vpop.f32.mrf.mxu0 }
 0x5dc   : > { %3288 = vmatprep.mubr.msk.f32.mxu1 %vm672_vm1, %v2199_v38  ;;  %3352 = vmatpush3.msra.mxu1 %v2474_v33 }
 0x5dd   : > { %3289 = vmatmul.mubr.msk.f32.gmra.mxu1 %vm672_vm1, %v2204_v10  ;;  %3345 = vmatprep.subr.mxu1 %v2473_v26  ;;  %v2410_v7 = vpop.f32.mrf.mxu0 }
 0x5de   : > { %3353 = vmatpush3.msra.mxu1 %v2473_v26 }
 0x5df   : > { %3346 = vmatprep.subr.mxu1 %v2472_v62  ;;  %v3304_v24 = vpop.f32.mrf.mxu0 }
 0x5e0   : > { %3354 = vmatpush3.msra.mxu1 %v2472_v62 }
 0x5e1   : > { %v2420_v30 = vpop.f32.mrf.mxu0 }
 0x5e3   : > { %v3307_v55 = vpop.f32.mrf.mxu0 }
 0x5e5   : > { %v2430_v4 = vpop.f32.mrf.mxu0 }
 0x5e7   : > { %v3310_v8 = vpop.f32.mrf.mxu0 }
 0x5e9   : > { %v2440_v23 = vpop.f32.mrf.mxu0 }
 0x691   : > { %v3281_v14 = vpop.f32.mrf.mxu1 }
 0x692   : > { %v2416_v45 = vadd.f32 %v3301_v49, %v3281_v14 }
 0x693   : > { %v2305_v63 = vpop.f32.mrf.mxu1 }
 0x694   : > { %v2411_v19 = vadd.f32 %v2410_v7, %v2305_v63  ;;  %v2457_v52 = vadd.f32 %v2940_v39, %v2416_v45 }
 0x695   : > { %v3284_v34 = vpop.f32.mrf.mxu1 }
 0x696   : > { %v2456_v43 = vadd.f32 %v2940_v39, %v2411_v19  ;;  %v2426_v31 = vadd.f32 %v3304_v24, %v3284_v34  ;;  %v2465_v32 = vmax.f32 %v2457_v52, 0.0 }
 0x697   : > { %v2315_v13 = vpop.f32.mrf.mxu1 }
 0x698   : > { %v2464_v12 = vmax.f32 %v2456_v43, 0.0  ;;  %v2421_v60 = vadd.f32 %v2420_v30, %v2315_v13  ;;  %v2459_v37 = vadd.f32 %v2940_v39, %v2426_v31 }
 0x699   : > { %v3287_v36 = vpop.f32.mrf.mxu1 }
 0x69a   : > { %v2458_v27 = vadd.f32 %v2940_v39, %v2421_v60  ;;  %v2436_v0 = vadd.f32 %v3307_v55, %v3287_v36  ;;  %3327 = vmatprep.mubr.msk.f32.mxu0 %vm1281_vm2, %v2464_v12  ;;  %v2467_v51 = vmax.f32 %v2459_v37, 0.0 }
 0x69b   : > { %v2325_v21 = vpop.f32.mrf.mxu1  ;;  %3328 = vmatmul.mubr.msk.f32.vlgmr.msra.gmra.mxu0 %vm1281_vm2, %v2465_v32 }
 0x69c   : > { %v2466_v9 = vmax.f32 %v2458_v27, 0.0  ;;  %v2431_v56 = vadd.f32 %v2430_v4, %v2325_v21  ;;  %v2461_v1 = vadd.f32 %v2940_v39, %v2436_v0 }
 0x69d   : > { %v3290_v42 = vpop.f32.mrf.mxu1 }
 0x69e   : > { %v2460_v35 = vadd.f32 %v2940_v39, %v2431_v56  ;;  %v2446_v11 = vadd.f32 %v3310_v8, %v3290_v42  ;;  %3330 = vmatprep.mubr.msk.f32.mxu1 %vm1281_vm2, %v2466_v9  ;;  %v2469_v18 = vmax.f32 %v2461_v1, 0.0 }
 0x69f   : > { %v2335_v22 = vpop.f32.mrf.mxu1  ;;  %3331 = vmatmul.mubr.msk.f32.vlgmr.msra.gmra.mxu1 %vm1281_vm2, %v2467_v51 }
 0x6a0   : > { %v2468_v53 = vmax.f32 %v2460_v35, 0.0  ;;  %v2441_v44 = vadd.f32 %v2440_v23, %v2335_v22  ;;  %v2463_v17 = vadd.f32 %v2940_v39, %v2446_v11 }
 0x6a2   : > { %v2462_v6 = vadd.f32 %v2940_v39, %v2441_v44  ;;  %3333 = vmatprep.mubr.msk.f32.mxu1 %vm1281_vm2, %v2468_v53  ;;  %v2471_v47 = vmax.f32 %v2463_v17, 0.0 }
 0x6a3   : > { %3334 = vmatmul.mubr.msk.f32.gmra.mxu1 %vm1281_vm2, %v2469_v18 }
 0x6a4   : > { %v2470_v41 = vmax.f32 %v2462_v6, 0.0 }
 0x6a6   : > { %3336 = vmatprep.mubr.msk.f32.mxu1 %vm1281_vm2, %v2470_v41 }
 0x6a7   : > { %3337 = vmatmul.mubr.msk.f32.gmra.mxu1 %vm1281_vm2, %v2471_v47 }
 0x75b   : > { %v3329_v29 = vpop.f32.mrf.mxu0 }
 0x75c   : > { %v2583_v50 = vadd.f32 %v3329_v29, %v2941_v20 }
 0x75d   : > { %v2577_v57 = vpop.f32.mrf.mxu0 }
 0x75e   : > { %v2617_v48 = vadd.f32 %v4735_v61, %v2583_v50  ;;  %v2578_v25 = vadd.f32 %v2941_v20, %v2577_v57 }
 0x75f   : > { %v3332_v15 = vpop.f32.mrf.mxu1 }
 0x760   : > { %2625 = vst.msk [vmem:[#allocation2 + $0x8] sm:$0xff] %vm672_vm1, %v2617_v48  ;;  %v2616_v28 = vadd.f32 %v4730_v5, %v2578_v25  ;;  %v2593_v38 = vadd.f32 %v3332_v15, %v2941_v20 }
 0x761   : > { %v2587_v10 = vpop.f32.mrf.mxu1 }
 0x762   : > { %2624 = vst.msk [vmem:[#allocation2] sm:$0xff] %vm672_vm1, %v2616_v28  ;;  %v2619_v46 = vadd.f32 %v4743_v58, %v2593_v38  ;;  %v2588_v59 = vadd.f32 %v2941_v20, %v2587_v10 }
 0x763   : > { %v3335_v33 = vpop.f32.mrf.mxu1 }
 0x764   : > { %2627 = vst.msk [vmem:[#allocation2 + $0x18] sm:$0xff] %vm672_vm1, %v2619_v46  ;;  %v2618_v26 = vadd.f32 %v4739_v16, %v2588_v59  ;;  %v2603_v62 = vadd.f32 %v3335_v33, %v2941_v20 }
 0x765   : > { %v2597_v61 = vpop.f32.mrf.mxu1 }
 0x766   : > { %2626 = vst.msk [vmem:[#allocation2 + $0x10] sm:$0xff] %vm672_vm1, %v2618_v26  ;;  %v2621_v49 = vadd.f32 %v4751_v54, %v2603_v62  ;;  %v2598_v7 = vadd.f32 %v2941_v20, %v2597_v61 }
 0x767   : > { %v3338_v5 = vpop.f32.mrf.mxu1 }
 0x768   : > { %2629 = vst.msk [vmem:[#allocation2 + $0x28] sm:$0xff] %vm672_vm1, %v2621_v49  ;;  %v2620_v24 = vadd.f32 %v4747_v2, %v2598_v7  ;;  %v2613_v30 = vadd.f32 %v3338_v5, %v2941_v20 }
 0x769   : > { %v2607_v58 = vpop.f32.mrf.mxu1 }
 0x76a   : > { %2628 = vst.msk [vmem:[#allocation2 + $0x20] sm:$0xff] %vm672_vm1, %v2620_v24  ;;  %v2623_v14 = vadd.f32 %v4759_v40, %v2613_v30  ;;  %v2608_v45 = vadd.f32 %v2941_v20, %v2607_v58  ;;  %2635 = sbr.rel (%p2950_p11) target bundleno = 1907 (0x773), region = 92 }
 0x76c   : > { %2631 = vst.msk [vmem:[#allocation2 + $0x38] sm:$0xff] %vm672_vm1, %v2623_v14  ;;  %v2622_v16 = vadd.f32 %v4755_v3, %v2608_v45 }
 0x76e   : > { %2630 = vst.msk [vmem:[#allocation2 + $0x30] sm:$0xff] %vm672_vm1, %v2622_v16 }
 0x76f   : > { %2636 = vst.msk [vmem:[%s4916_s15] sm:$0xff] %vm672_vm1, %v2616_v28  ;;  %2637 = vst.msk [vmem:[%s4916_s15 + $0x8] sm:$0xff] %vm672_vm1, %v2617_v48 }
 0x770   : > { %2638 = vst.msk [vmem:[%s4916_s15 + $0x10] sm:$0xff] %vm672_vm1, %v2618_v26  ;;  %2639 = vst.msk [vmem:[%s4916_s15 + $0x18] sm:$0xff] %vm672_vm1, %v2619_v46 }
 0x771   : > { %2640 = vst.msk [vmem:[%s4916_s15 + $0x20] sm:$0xff] %vm672_vm1, %v2620_v24  ;;  %2641 = vst.msk [vmem:[%s4916_s15 + $0x28] sm:$0xff] %vm672_vm1, %v2621_v49 }
 0x772   : > { %2642 = vst.msk [vmem:[%s4916_s15 + $0x30] sm:$0xff] %vm672_vm1, %v2622_v16  ;;  %2643 = vst.msk [vmem:[%s4916_s15 + $0x38] sm:$0xff] %vm672_vm1, %v2623_v14 }
 0x773 PF: > { %s4917_s24 = sld [smem:[#allocation14_spill]]  ;;  %s4920_s21 = smov %s3696_s22 }
 0x774   : > { %s4918_s18 = sld [smem:[#allocation13_spill]] }
 0x775   : > { %s4919_s23 = sld [smem:[#allocation15_spill]] }
 0x779   : > { %p28_p13 = scmp.ge.s32.totalorder %s4917_s24, 6  }
 0x77a   : > { %s4921_s22 = smov %s4918_s18 }
 0x77b   :  { %30 = sbr.rel (!%p28_p13) target bundleno = 17 (0x11), region = 167 }
 0x780   :  { %2655 = vsyncpa [#allocation4], 1 }
 0x781   :  { %2657 = vsyncpa [#allocation4 + $0x1], 1 }
 0x782   :  { %2658 = vsyncpa [#allocation6], 1 }
 0x783   :  { %2660 = vsyncpa [#allocation6 + $0x1], 1 }
 0x784   :  { %2661 = vsyncpa [#allocation9], 1 }
 0x785   :  { %2663 = vsyncpa [#allocation9 + $0x1], 1 }

</bundles_post_ra>
